<compile_context>
chip_gen: v7x
topology: tpu7x:2x2x1
jax: 0.10.0
libtpu: 0.0.40
codegen_flags: <defaults>
</compile_context>

<pallas_src>
import functools

import jax
import jax.numpy as jnp
from jax import lax
from jax.experimental import pallas as pl
from jax.experimental.pallas import tpu as pltpu


# ----------------------------------------------------------------------------
# Shared LayerNorm helper (matches nn.LayerNorm, eps=1e-5).
# ----------------------------------------------------------------------------
def _layer_norm(x, gamma, beta, eps=1e-5):
    mean = jnp.mean(x, axis=-1, keepdims=True)
    xc = x - mean
    var = jnp.mean(xc * xc, axis=-1, keepdims=True)
    return xc * lax.rsqrt(var + eps) * gamma + beta


# ----------------------------------------------------------------------------
# Kernel: one encoder layer for one batch block; grid = (batch_blocks, layers).
# The activation lives in a VMEM scratch that is carried across the layer axis.
# ----------------------------------------------------------------------------
def informer_layer_kernel(
    x_ref,       # (Bt*S, D)  f32   -- read only at layer 0
    wqkv_ref,    # (1, D, 3D) bf16  in_proj_weight^T, Q cols pre-scaled
    bqkv_ref,    # (1, 1, 3D) f32
    wo_ref,      # (1, D, D)  bf16  out_proj.weight^T
    bo_ref,      # (1, 1, D)  f32
    w1_ref,      # (1, D, F)  bf16  linear1.weight^T
    b1_ref,      # (1, 1, F)  f32
    w2_ref,      # (1, F, D)  bf16  linear2.weight^T
    b2_ref,      # (1, 1, D)  f32
    g1_ref,      # (1, 1, D)  f32   norm1.weight
    bt1_ref,     # (1, 1, D)  f32   norm1.bias
    g2_ref,      # (1, 1, D)  f32   norm2.weight
    bt2_ref,     # (1, 1, D)  f32   norm2.bias
    o_ref,       # (Bt*S, D)  f32   -- written only at the last layer
    x_scr,       # (Bt*S, D)  f32   VMEM activation carry
    *,
    n_heads: int,
    n_layers: int,
    batch_block: int,
    seq_len: int,
    mxu_dtype,
    kv_chunk: int,
    ff_chunk: int,
):
    l = pl.program_id(1)
    Bt, S, H = batch_block, seq_len, n_heads

    @pl.when(l == 0)
    def _():
        x_scr[...] = x_ref[...].astype(jnp.float32)

    x = x_scr[...]                                # (M, D)
    M, D = x.shape
    dh = D // H
    Z = Bt * H

    def mm(a, b):
        # MXU matmul: bf16 operands (default), f32 accumulation.
        return jnp.dot(a.astype(mxu_dtype), b.astype(mxu_dtype),
                       preferred_element_type=jnp.float32)

    def to_heads(t):                              # (M, D) -> (Bt*H, S, dh)
        # TODO(synk): replace these relayouts with batched dot_general carrying
        # the head axis directly once that form is validated under Mosaic.
        return (t.reshape(Bt, S, H, dh)
                 .transpose(0, 2, 1, 3)
                 .reshape(Z, S, dh))

    # ---- multi-head self-attention (nn.MultiheadAttention semantics) -------
    qkv = mm(x, wqkv_ref[0]) + bqkv_ref[0]        # (M, 3D); Q already scaled
    q = to_heads(qkv[:, :D]).astype(mxu_dtype)
    k = to_heads(qkv[:, D:2 * D])
    v = to_heads(qkv[:, 2 * D:])

    # Flash-style accumulation over KV chunks (bounds VMEM to O(S*dh) per head
    # at production sequence lengths; collapses to plain softmax for S<=chunk).
    n_kv = -(-S // kv_chunk)
    m_run = jnp.full((Z, S, 1), -jnp.inf, dtype=jnp.float32)
    l_run = jnp.zeros((Z, S, 1), dtype=jnp.float32)
    acc = jnp.zeros((Z, S, dh), dtype=jnp.float32)
    for c in range(n_kv):
        c0 = c * kv_chunk
        c1 = min(S, c0 + kv_chunk)
        kc = k[:, c0:c1, :].astype(mxu_dtype)
        vc = v[:, c0:c1, :].astype(mxu_dtype)
        s = jnp.einsum("zqd,zkd->zqk", q, kc,
                       preferred_element_type=jnp.float32)      # (Z, S, Tk)
        m_new = jnp.maximum(m_run, jnp.max(s, axis=-1, keepdims=True))
        alpha = jnp.exp(m_run - m_new)
        p = jnp.exp(s - m_new)
        l_run = alpha * l_run + jnp.sum(p, axis=-1, keepdims=True)
        acc = alpha * acc + jnp.einsum("zqk,zkd->zqd",
                                       p.astype(mxu_dtype), vc,
                                       preferred_element_type=jnp.float32)
        m_run = m_new

    a = acc * pl.reciprocal(l_run, approx=True)   # EUP reciprocal
    attn = (a.reshape(Bt, H, S, dh)
              .transpose(0, 2, 1, 3)
              .reshape(M, D))
    attn = mm(attn, wo_ref[0]) + bo_ref[0]

    # ---- residual + LayerNorm 1 ---------------------------------------------
    x = _layer_norm(x + attn, g1_ref[0], bt1_ref[0])

    # ---- position-wise FFN, chunked over d_ff --------------------------------
    w1 = w1_ref[0]                                # (D, F)
    b1 = b1_ref[0]                                # (1, F)
    w2 = w2_ref[0]                                # (F, D)
    F_dim = w1.shape[-1]
    n_ff = -(-F_dim // ff_chunk)
    ff = jnp.zeros((M, D), dtype=jnp.float32)
    for c in range(n_ff):
        c0 = c * ff_chunk
        c1 = min(F_dim, c0 + ff_chunk)
        h = jnp.maximum(mm(x, w1[:, c0:c1]) + b1[:, c0:c1], 0.0)
        ff = ff + mm(h, w2[c0:c1, :])
    ff = ff + b2_ref[0]

    # ---- residual + LayerNorm 2 ---------------------------------------------
    x = _layer_norm(x + ff, g2_ref[0], bt2_ref[0])

    x_scr[...] = x                                # carry to the next layer

    @pl.when(l == n_layers - 1)
    def _():
        o_ref[...] = x.astype(o_ref.dtype)


# ----------------------------------------------------------------------------
# Wrapper helpers.
# ----------------------------------------------------------------------------
def _vmem_limit_bytes():
    """Per-generation VMEM budget (~85% of physical)."""
    cap = None
    try:
        cap = getattr(pltpu.get_tpu_info(), "vmem_capacity_bytes", None)
    except Exception:
        cap = None
    if cap is None:
        kind = ""
        try:
            kind = jax.devices()[0].device_kind.lower()
        except Exception:
            pass
        if "v7" in kind:
            cap = 64 * 1024 * 1024
        elif "v5" in kind or "v6" in kind:
            cap = 128 * 1024 * 1024
        else:
            cap = 64 * 1024 * 1024      # conservative default
    return int(cap * 0.85)


def _pick_batch_block(B, S, *, target_rows=512, min_blocks=2):
    """Largest divisor of B s.t. rows stay sublane-aligned, the grid keeps at
    least `min_blocks` parallel blocks (v7x megacore), and Bt*S ~ target_rows."""
    valid = [d for d in range(1, B + 1)
             if B % d == 0 and ((d * S) % 8 == 0 or d == B)]
    if not valid:
        return B
    preferred = [d for d in valid if B // d >= min_blocks] or valid
    for d in preferred:
        if d * S >= target_rows:
            return d
    return preferred[-1]


def informer_encoder_pallas(x_sbd, packed_params, n_heads, *,
                            mxu_dtype=jnp.bfloat16, target_rows=512,
                            kv_chunk=512, ff_chunk=512):
    """x_sbd: (seq, batch, d_model) — PyTorch batch_first=False layout."""
    S, B, D = x_sbd.shape
    L = packed_params[0].shape[0]
    F_dim = packed_params[4].shape[-1]

    Bt = _pick_batch_block(B, S, target_rows=target_rows, min_blocks=2)

    # (S, B, D) -> (B, S, D) -> (B*S, D) row slab.
    x2d = jnp.transpose(x_sbd, (1, 0, 2)).reshape(B * S, D).astype(jnp.float32)

    in_specs = [pl.BlockSpec((Bt * S, D), lambda b, l: (b, 0))]
    for p in packed_params:
        # One layer's slab per grid step; next layer prefetched by the pipeline.
        in_specs.append(pl.BlockSpec((1,) + p.shape[1:], lambda b, l: (l, 0, 0)))
    out_specs = pl.BlockSpec((Bt * S, D), lambda b, l: (b, 0))

    kernel = functools.partial(
        informer_layer_kernel,
        n_heads=n_heads, n_layers=L, batch_block=Bt, seq_len=S,
        mxu_dtype=mxu_dtype,
        kv_chunk=min(kv_chunk, S),
        ff_chunk=min(ff_chunk, F_dim))

    out2d = pl.pallas_call(
        kernel,
        out_shape=jax.ShapeDtypeStruct((B * S, D), jnp.float32),
        grid_spec=pltpu.PrefetchScalarGridSpec(
            num_scalar_prefetch=0,
            grid=(B // Bt, L),                    # layer axis last (sequential)
            in_specs=in_specs,
            out_specs=out_specs,
            scratch_shapes=[pltpu.VMEM((Bt * S, D), jnp.float32)]),
        compiler_params=pltpu.CompilerParams(
            dimension_semantics=("parallel", "arbitrary"),
            vmem_limit_bytes=_vmem_limit_bytes()),
    )(x2d, *packed_params)

    return out2d.reshape(B, S, D).transpose(1, 0, 2)   # -> (S, B, D)


# ----------------------------------------------------------------------------
# Parameter handling: PyTorch-layout per-layer params -> stacked, pre-
# transposed, bf16 kernel operands with the softmax scale folded into Q.
# ----------------------------------------------------------------------------
def make_layer_params(key, d_model, d_ff):
    """Shapes follow EncoderLayer.__init__ / nn.MultiheadAttention."""
    ks = jax.random.split(key, 12)
    n = lambda k, shp, s=0.1: (s * jax.random.normal(k, shp)).astype(jnp.float32)
    return (
        n(ks[0], (3 * d_model, d_model)),     # in_proj_weight
        n(ks[1], (3 * d_model,)),             # in_proj_bias
        n(ks[2], (d_model, d_model)),         # out_proj.weight
        n(ks[3], (d_model,)),                 # out_proj.bias
        n(ks[4], (d_ff, d_model)),            # linear1.weight
        n(ks[5], (d_ff,)),                    # linear1.bias
        n(ks[6], (d_model, d_ff)),            # linear2.weight
        n(ks[7], (d_model,)),                 # linear2.bias
        1.0 + n(ks[8], (d_model,), 0.05),     # norm1.weight
        n(ks[9], (d_model,), 0.05),           # norm1.bias
        1.0 + n(ks[10], (d_model,), 0.05),    # norm2.weight
        n(ks[11], (d_model,), 0.05),          # norm2.bias
    )


def pack_params(layer_params, n_heads, weight_dtype=jnp.bfloat16):
    """Stack per-layer PyTorch-layout params, pre-transpose the weights, fold
    1/sqrt(dh) into the Q rows of in_proj, and store weight matrices in bf16
    (biases / LayerNorm params stay f32)."""
    D = layer_params[0][0].shape[1]
    dh = D // n_heads
    scale = dh ** -0.5
    qkv_scale = jnp.concatenate(
        [jnp.full((D,), scale, jnp.float32), jnp.ones((2 * D,), jnp.float32)])

    row = lambda a: a.reshape(1, -1)
    st = lambda f: jnp.stack([f(p) for p in layer_params])
    return (
        st(lambda p: (p[0] * qkv_scale[:, None]).T.astype(weight_dtype)),  # (L,D,3D)
        st(lambda p: row(p[1] * qkv_scale)),                               # (L,1,3D)
        st(lambda p: p[2].T.astype(weight_dtype)),                         # (L,D,D)
        st(lambda p: row(p[3])),                                           # (L,1,D)
        st(lambda p: p[4].T.astype(weight_dtype)),                         # (L,D,F)
        st(lambda p: row(p[5])),                                           # (L,1,F)
        st(lambda p: p[6].T.astype(weight_dtype)),                         # (L,F,D)
        st(lambda p: row(p[7])),                                           # (L,1,D)
        st(lambda p: row(p[8])), st(lambda p: row(p[9])),
        st(lambda p: row(p[10])), st(lambda p: row(p[11])),
    )


# ----------------------------------------------------------------------------
# Pure-JAX f32 reference (PyTorch semantics) for correctness.
# ----------------------------------------------------------------------------
def _ref_layer(x_bsd, p, n_heads):
    (wqkv, bqkv, wo, bo, w1, b1, w2, b2, g1, bt1, g2, bt2) = p
    B, S, D = x_bsd.shape
    H, dh = n_heads, D // n_heads
    qkv = x_bsd @ wqkv.T + bqkv
    q, k, v = qkv[..., :D], qkv[..., D:2 * D], qkv[..., 2 * D:]

    def heads(t):   # (B,S,D) -> (B,H,S,dh)
        return t.reshape(B, S, H, dh).transpose(0, 2, 1, 3)

    qh, kh, vh = heads(q) * (dh ** -0.5), heads(k), heads(v)
    s = jnp.einsum("bhqd,bhkd->bhqk", qh, kh)
    pa = jax.nn.softmax(s, axis=-1)
    a = jnp.einsum("bhqk,bhkd->bhqd", pa, vh).transpose(0, 2, 1, 3).reshape(B, S, D)
    a = a @ wo.T + bo
    x1 = _layer_norm(x_bsd + a, g1, bt1)
    ff = jnp.maximum(x1 @ w1.T + b1, 0.0) @ w2.T + b2
    return _layer_norm(x1 + ff, g2, bt2)


def informer_encoder_ref(x_sbd, layer_params, n_heads):
    x = jnp.transpose(x_sbd, (1, 0, 2))
    for p in layer_params:
        x = _ref_layer(x, p, n_heads)
    return jnp.transpose(x, (1, 0, 2))


if __name__ == "__main__":
    d_model, n_heads, d_ff, num_layers = 32, 4, 64, 2
    seq_len, batch = 8, 2

    key = jax.random.PRNGKey(0)
    k_x, k_p = jax.random.split(key)
    # PyTorch layout for batch_first=False MHA: (seq, batch, d_model)
    x = jax.random.normal(k_x, (seq_len, batch, d_model), dtype=jnp.float32)

    layer_keys = jax.random.split(k_p, num_layers)
    layer_params = [make_layer_params(lk, d_model, d_ff) for lk in layer_keys]
    packed = pack_params(layer_params, n_heads)          # bf16 weights in HBM

    out = informer_encoder_pallas(x, packed, n_heads)    # bf16 MXU, f32 acc
    out = jax.block_until_ready(out)

    ref = jax.block_until_ready(informer_encoder_ref(x, layer_params, n_heads))
    assert out.shape == (seq_len, batch, d_model)
    # Tolerance covers bf16 weight storage / MXU operands and the approximate
    # EUP reciprocal in the softmax denominator (vs. the f32 reference).
    assert jnp.allclose(out, ref, atol=3e-2, rtol=3e-2), "mismatch vs reference"

    print("KERNEL_OK")
</pallas_src>

<mosaic_0001>
module attributes {stable_mosaic.version = 11 : i64} {
  func.func @informer_layer_kernel(%arg0: i32, %arg1: i32, %arg2: memref<8x32xf32, #tpu.memory_space<vmem>>, %arg3: memref<1x32x96xbf16, #tpu.memory_space<vmem>>, %arg4: memref<1x1x96xf32, #tpu.memory_space<vmem>>, %arg5: memref<1x32x32xbf16, #tpu.memory_space<vmem>>, %arg6: memref<1x1x32xf32, #tpu.memory_space<vmem>>, %arg7: memref<1x32x64xbf16, #tpu.memory_space<vmem>>, %arg8: memref<1x1x64xf32, #tpu.memory_space<vmem>>, %arg9: memref<1x64x32xbf16, #tpu.memory_space<vmem>>, %arg10: memref<1x1x32xf32, #tpu.memory_space<vmem>>, %arg11: memref<1x1x32xf32, #tpu.memory_space<vmem>>, %arg12: memref<1x1x32xf32, #tpu.memory_space<vmem>>, %arg13: memref<1x1x32xf32, #tpu.memory_space<vmem>>, %arg14: memref<1x1x32xf32, #tpu.memory_space<vmem>>, %arg15: memref<8x32xf32, #tpu.memory_space<vmem>>, %arg16: memref<8x32xf32, #tpu.memory_space<vmem>>) attributes {dimension_semantics = [#tpu.dimension_semantics<parallel>, #tpu.dimension_semantics<arbitrary>], iteration_bounds = array<i64: 2, 2>, scalar_prefetch = 0 : i64, scratch_operands = 1 : i64, tpu.core_type = #tpu.core_type<tc>, window_params = [{transform_indices = @transform_0, window_bounds = array<i64: 8, 32>}, {transform_indices = @transform_1, window_bounds = array<i64: 1, 32, 96>}, {transform_indices = @transform_2, window_bounds = array<i64: 1, 1, 96>}, {transform_indices = @transform_3, window_bounds = array<i64: 1, 32, 32>}, {transform_indices = @transform_4, window_bounds = array<i64: 1, 1, 32>}, {transform_indices = @transform_5, window_bounds = array<i64: 1, 32, 64>}, {transform_indices = @transform_6, window_bounds = array<i64: 1, 1, 64>}, {transform_indices = @transform_7, window_bounds = array<i64: 1, 64, 32>}, {transform_indices = @transform_8, window_bounds = array<i64: 1, 1, 32>}, {transform_indices = @transform_9, window_bounds = array<i64: 1, 1, 32>}, {transform_indices = @transform_10, window_bounds = array<i64: 1, 1, 32>}, {transform_indices = @transform_11, window_bounds = array<i64: 1, 1, 32>}, {transform_indices = @transform_12, window_bounds = array<i64: 1, 1, 32>}, {transform_indices = @transform_13, window_bounds = array<i64: 8, 32>}]} {
    %c0_i32 = arith.constant 0 : i32
    %0 = arith.cmpi eq, %arg1, %c0_i32 : i32
    %1 = arith.extui %0 : i1 to i32
    %c0_i32_0 = arith.constant 0 : i32
    %2 = arith.cmpi ne, %1, %c0_i32_0 : i32
    scf.if %2 {
      %c0_63 = arith.constant 0 : index
      %c0_64 = arith.constant 0 : index
      %136 = vector.load %arg2[%c0_63, %c0_64] : memref<8x32xf32, #tpu.memory_space<vmem>>, vector<8x32xf32>
      %c0_65 = arith.constant 0 : index
      %c0_66 = arith.constant 0 : index
      %137 = vector.load %arg16[%c0_65, %c0_66] : memref<8x32xf32, #tpu.memory_space<vmem>>, vector<8x32xf32>
      tpu.vector_store %arg16[%c0_65, %c0_66], %136 {strides = array<i32>} : memref<8x32xf32, #tpu.memory_space<vmem>>, vector<8x32xf32>,
    } else {
    }
    %c0 = arith.constant 0 : index
    %c0_1 = arith.constant 0 : index
    %3 = vector.load %arg16[%c0, %c0_1] : memref<8x32xf32, #tpu.memory_space<vmem>>, vector<8x32xf32>
    %c0_2 = arith.constant 0 : index
    %c0_3 = arith.constant 0 : index
    %c0_4 = arith.constant 0 : index
    %4 = vector.load %arg3[%c0_2, %c0_3, %c0_4] : memref<1x32x96xbf16, #tpu.memory_space<vmem>>, vector<1x32x96xbf16>
    %5 = vector.shape_cast %4 : vector<1x32x96xbf16> to vector<32x96xbf16>
    %6 = arith.truncf %3 : vector<8x32xf32> to vector<8x32xbf16>
    %cst = arith.constant dense<0.000000e+00> : vector<8x96xf32>
    %7 = tpu.matmul %6, %5, %cst {dimension_numbers = #tpu.dot_dimension_numbers<[1], [0], [0], [1], [0, 0, 1, 1], [], []>} : vector<8x32xbf16>, vector<32x96xbf16>, vector<8x96xf32> -> vector<8x96xf32>
    %c0_5 = arith.constant 0 : index
    %c0_6 = arith.constant 0 : index
    %c0_7 = arith.constant 0 : index
    %8 = vector.load %arg4[%c0_5, %c0_6, %c0_7] : memref<1x1x96xf32, #tpu.memory_space<vmem>>, vector<1x1x96xf32>
    %9 = vector.shape_cast %8 : vector<1x1x96xf32> to vector<1x96xf32>
    %10 = vector.broadcast %9 : vector<1x96xf32> to vector<8x96xf32>
    %11 = arith.addf %7, %10 : vector<8x96xf32>
    %12 = vector.extract_strided_slice %11 {offsets = [0, 0], sizes = [8, 32], strides = [1, 1]} : vector<8x96xf32> to vector<8x32xf32>
    %13 = vector.shape_cast %12 : vector<8x32xf32> to vector<1x8x4x8xf32>
    %14 = tpu.transpose %13, [0, 2, 1, 3] : vector<1x8x4x8xf32> -> vector<1x4x8x8xf32>
    %15 = vector.shape_cast %14 : vector<1x4x8x8xf32> to vector<4x8x8xf32>
    %16 = arith.truncf %15 : vector<4x8x8xf32> to vector<4x8x8xbf16>
    %17 = vector.extract_strided_slice %11 {offsets = [0, 32], sizes = [8, 32], strides = [1, 1]} : vector<8x96xf32> to vector<8x32xf32>
    %18 = vector.shape_cast %17 : vector<8x32xf32> to vector<1x8x4x8xf32>
    %19 = tpu.transpose %18, [0, 2, 1, 3] : vector<1x8x4x8xf32> -> vector<1x4x8x8xf32>
    %20 = vector.shape_cast %19 : vector<1x4x8x8xf32> to vector<4x8x8xf32>
    %21 = vector.extract_strided_slice %11 {offsets = [0, 64], sizes = [8, 32], strides = [1, 1]} : vector<8x96xf32> to vector<8x32xf32>
    %22 = vector.shape_cast %21 : vector<8x32xf32> to vector<1x8x4x8xf32>
    %23 = tpu.transpose %22, [0, 2, 1, 3] : vector<1x8x4x8xf32> -> vector<1x4x8x8xf32>
    %24 = vector.shape_cast %23 : vector<1x4x8x8xf32> to vector<4x8x8xf32>
    %cst_8 = arith.constant 0xFF800000 : f32
    %25 = vector.broadcast %cst_8 : f32 to vector<4x8x1xf32>
    %cst_9 = arith.constant 0.000000e+00 : f32
    %26 = vector.broadcast %cst_9 : f32 to vector<4x8x1xf32>
    %cst_10 = arith.constant 0.000000e+00 : f32
    %27 = vector.broadcast %cst_10 : f32 to vector<4x8x8xf32>
    %28 = arith.truncf %20 : vector<4x8x8xf32> to vector<4x8x8xbf16>
    %29 = arith.truncf %24 : vector<4x8x8xf32> to vector<4x8x8xbf16>
    "tpu.trace_start"() <{level = 10 : i32, message = "zqd,zkd->zqk"}> : () -> ()
    %cst_11 = arith.constant dense<0.000000e+00> : vector<4x8x8xf32>
    %30 = tpu.matmul %16, %28, %cst_11 {dimension_numbers = #tpu.dot_dimension_numbers<[2], [2], [1], [1], [0, 0, 0, 1, 1, 1], [0], [0]>} : vector<4x8x8xbf16>, vector<4x8x8xbf16>, vector<4x8x8xf32> -> vector<4x8x8xf32>
    "tpu.trace_stop"() : () -> ()
    %cst_12 = arith.constant dense<0xFF800000> : vector<4x8xf32>
    %31 = vector.multi_reduction <maximumf>, %30, %cst_12 [2] : vector<4x8x8xf32> to vector<4x8xf32>
    %32 = vector.shape_cast %31 : vector<4x8xf32> to vector<4x8x1xf32>
    %33 = arith.maximumf %25, %32 : vector<4x8x1xf32>
    %34 = arith.subf %25, %33 : vector<4x8x1xf32>
    %35 = math.exp %34 : vector<4x8x1xf32>
    %36 = vector.broadcast %33 : vector<4x8x1xf32> to vector<4x8x8xf32>
    %37 = arith.subf %30, %36 : vector<4x8x8xf32>
    %38 = math.exp %37 : vector<4x8x8xf32>
    %39 = arith.mulf %35, %26 : vector<4x8x1xf32>
    %cst_13 = arith.constant dense<0.000000e+00> : vector<4x8xf32>
    %40 = vector.multi_reduction <add>, %38, %cst_13 [2] : vector<4x8x8xf32> to vector<4x8xf32>
    %41 = vector.shape_cast %40 : vector<4x8xf32> to vector<4x8x1xf32>
    %42 = arith.addf %39, %41 : vector<4x8x1xf32>
    %43 = vector.broadcast %35 : vector<4x8x1xf32> to vector<4x8x8xf32>
    %44 = arith.mulf %43, %27 : vector<4x8x8xf32>
    %45 = arith.truncf %38 : vector<4x8x8xf32> to vector<4x8x8xbf16>
    "tpu.trace_start"() <{level = 10 : i32, message = "zqk,zkd->zqd"}> : () -> ()
    %cst_14 = arith.constant dense<0.000000e+00> : vector<4x8x8xf32>
    %46 = tpu.matmul %45, %29, %cst_14 {dimension_numbers = #tpu.dot_dimension_numbers<[2], [1], [1], [2], [0, 0, 0, 1, 1, 2], [0], [0]>} : vector<4x8x8xbf16>, vector<4x8x8xbf16>, vector<4x8x8xf32> -> vector<4x8x8xf32>
    "tpu.trace_stop"() : () -> ()
    %47 = arith.addf %44, %46 : vector<4x8x8xf32>
    %48 = tpu.reciprocal %42 {approx = true} : vector<4x8x1xf32> -> vector<4x8x1xf32>
    %49 = vector.broadcast %48 : vector<4x8x1xf32> to vector<4x8x8xf32>
    %50 = arith.mulf %47, %49 : vector<4x8x8xf32>
    %51 = vector.shape_cast %50 : vector<4x8x8xf32> to vector<1x4x8x8xf32>
    %52 = tpu.transpose %51, [0, 2, 1, 3] : vector<1x4x8x8xf32> -> vector<1x8x4x8xf32>
    %53 = vector.shape_cast %52 : vector<1x8x4x8xf32> to vector<8x32xf32>
    %c0_15 = arith.constant 0 : index
    %c0_16 = arith.constant 0 : index
    %c0_17 = arith.constant 0 : index
    %54 = vector.load %arg5[%c0_15, %c0_16, %c0_17] : memref<1x32x32xbf16, #tpu.memory_space<vmem>>, vector<1x32x32xbf16>
    %55 = vector.shape_cast %54 : vector<1x32x32xbf16> to vector<32x32xbf16>
    %56 = arith.truncf %53 : vector<8x32xf32> to vector<8x32xbf16>
    %cst_18 = arith.constant dense<0.000000e+00> : vector<8x32xf32>
    %57 = tpu.matmul %56, %55, %cst_18 {dimension_numbers = #tpu.dot_dimension_numbers<[1], [0], [0], [1], [0, 0, 1, 1], [], []>} : vector<8x32xbf16>, vector<32x32xbf16>, vector<8x32xf32> -> vector<8x32xf32>
    %c0_19 = arith.constant 0 : index
    %c0_20 = arith.constant 0 : index
    %c0_21 = arith.constant 0 : index
    %58 = vector.load %arg6[%c0_19, %c0_20, %c0_21] : memref<1x1x32xf32, #tpu.memory_space<vmem>>, vector<1x1x32xf32>
    %59 = vector.shape_cast %58 : vector<1x1x32xf32> to vector<1x32xf32>
    %60 = vector.broadcast %59 : vector<1x32xf32> to vector<8x32xf32>
    %61 = arith.addf %57, %60 : vector<8x32xf32>
    %62 = arith.addf %3, %61 : vector<8x32xf32>
    %c0_22 = arith.constant 0 : index
    %c0_23 = arith.constant 0 : index
    %c0_24 = arith.constant 0 : index
    %63 = vector.load %arg11[%c0_22, %c0_23, %c0_24] : memref<1x1x32xf32, #tpu.memory_space<vmem>>, vector<1x1x32xf32>
    %64 = vector.shape_cast %63 : vector<1x1x32xf32> to vector<1x32xf32>
    %c0_25 = arith.constant 0 : index
    %c0_26 = arith.constant 0 : index
    %c0_27 = arith.constant 0 : index
    %65 = vector.load %arg12[%c0_25, %c0_26, %c0_27] : memref<1x1x32xf32, #tpu.memory_space<vmem>>, vector<1x1x32xf32>
    %66 = vector.shape_cast %65 : vector<1x1x32xf32> to vector<1x32xf32>
    %cst_28 = arith.constant dense<0.000000e+00> : vector<8xf32>
    %67 = vector.multi_reduction <add>, %62, %cst_28 [1] : vector<8x32xf32> to vector<8xf32>
    %68 = vector.shape_cast %67 : vector<8xf32> to vector<8x1xf32>
    %cst_29 = arith.constant 3.200000e+01 : f32
    %69 = vector.broadcast %cst_29 : f32 to vector<8x1xf32>
    %70 = arith.divf %68, %69 : vector<8x1xf32>
    %71 = vector.broadcast %70 : vector<8x1xf32> to vector<8x32xf32>
    %72 = arith.subf %62, %71 : vector<8x32xf32>
    %73 = arith.mulf %72, %72 : vector<8x32xf32>
    %cst_30 = arith.constant dense<0.000000e+00> : vector<8xf32>
    %74 = vector.multi_reduction <add>, %73, %cst_30 [1] : vector<8x32xf32> to vector<8xf32>
    %75 = vector.shape_cast %74 : vector<8xf32> to vector<8x1xf32>
    %cst_31 = arith.constant 3.200000e+01 : f32
    %76 = vector.broadcast %cst_31 : f32 to vector<8x1xf32>
    %77 = arith.divf %75, %76 : vector<8x1xf32>
    %cst_32 = arith.constant 9.99999974E-6 : f32
    %78 = vector.broadcast %cst_32 : f32 to vector<8x1xf32>
    %79 = arith.addf %77, %78 : vector<8x1xf32>
    %80 = math.rsqrt %79 : vector<8x1xf32>
    %81 = vector.broadcast %80 : vector<8x1xf32> to vector<8x32xf32>
    %82 = arith.mulf %72, %81 : vector<8x32xf32>
    %83 = vector.broadcast %64 : vector<1x32xf32> to vector<8x32xf32>
    %84 = arith.mulf %82, %83 : vector<8x32xf32>
    %85 = vector.broadcast %66 : vector<1x32xf32> to vector<8x32xf32>
    %86 = arith.addf %84, %85 : vector<8x32xf32>
    %c0_33 = arith.constant 0 : index
    %c0_34 = arith.constant 0 : index
    %c0_35 = arith.constant 0 : index
    %87 = vector.load %arg7[%c0_33, %c0_34, %c0_35] : memref<1x32x64xbf16, #tpu.memory_space<vmem>>, vector<1x32x64xbf16>
    %88 = vector.shape_cast %87 : vector<1x32x64xbf16> to vector<32x64xbf16>
    %c0_36 = arith.constant 0 : index
    %c0_37 = arith.constant 0 : index
    %c0_38 = arith.constant 0 : index
    %89 = vector.load %arg8[%c0_36, %c0_37, %c0_38] : memref<1x1x64xf32, #tpu.memory_space<vmem>>, vector<1x1x64xf32>
    %90 = vector.shape_cast %89 : vector<1x1x64xf32> to vector<1x64xf32>
    %c0_39 = arith.constant 0 : index
    %c0_40 = arith.constant 0 : index
    %c0_41 = arith.constant 0 : index
    %91 = vector.load %arg9[%c0_39, %c0_40, %c0_41] : memref<1x64x32xbf16, #tpu.memory_space<vmem>>, vector<1x64x32xbf16>
    %92 = vector.shape_cast %91 : vector<1x64x32xbf16> to vector<64x32xbf16>
    %cst_42 = arith.constant 0.000000e+00 : f32
    %93 = vector.broadcast %cst_42 : f32 to vector<8x32xf32>
    %94 = arith.truncf %86 : vector<8x32xf32> to vector<8x32xbf16>
    %cst_43 = arith.constant dense<0.000000e+00> : vector<8x64xf32>
    %95 = tpu.matmul %94, %88, %cst_43 {dimension_numbers = #tpu.dot_dimension_numbers<[1], [0], [0], [1], [0, 0, 1, 1], [], []>} : vector<8x32xbf16>, vector<32x64xbf16>, vector<8x64xf32> -> vector<8x64xf32>
    %96 = vector.broadcast %90 : vector<1x64xf32> to vector<8x64xf32>
    %97 = arith.addf %95, %96 : vector<8x64xf32>
    %cst_44 = arith.constant 0.000000e+00 : f32
    %98 = vector.broadcast %cst_44 : f32 to vector<8x64xf32>
    %99 = arith.maximumf %97, %98 : vector<8x64xf32>
    %100 = arith.truncf %99 : vector<8x64xf32> to vector<8x64xbf16>
    %cst_45 = arith.constant dense<0.000000e+00> : vector<8x32xf32>
    %101 = tpu.matmul %100, %92, %cst_45 {dimension_numbers = #tpu.dot_dimension_numbers<[1], [0], [0], [1], [0, 0, 1, 1], [], []>} : vector<8x64xbf16>, vector<64x32xbf16>, vector<8x32xf32> -> vector<8x32xf32>
    %102 = arith.addf %93, %101 : vector<8x32xf32>
    %c0_46 = arith.constant 0 : index
    %c0_47 = arith.constant 0 : index
    %c0_48 = arith.constant 0 : index
    %103 = vector.load %arg10[%c0_46, %c0_47, %c0_48] : memref<1x1x32xf32, #tpu.memory_space<vmem>>, vector<1x1x32xf32>
    %104 = vector.shape_cast %103 : vector<1x1x32xf32> to vector<1x32xf32>
    %105 = vector.broadcast %104 : vector<1x32xf32> to vector<8x32xf32>
    %106 = arith.addf %102, %105 : vector<8x32xf32>
    %107 = arith.addf %86, %106 : vector<8x32xf32>
    %c0_49 = arith.constant 0 : index
    %c0_50 = arith.constant 0 : index
    %c0_51 = arith.constant 0 : index
    %108 = vector.load %arg13[%c0_49, %c0_50, %c0_51] : memref<1x1x32xf32, #tpu.memory_space<vmem>>, vector<1x1x32xf32>
    %109 = vector.shape_cast %108 : vector<1x1x32xf32> to vector<1x32xf32>
    %c0_52 = arith.constant 0 : index
    %c0_53 = arith.constant 0 : index
    %c0_54 = arith.constant 0 : index
    %110 = vector.load %arg14[%c0_52, %c0_53, %c0_54] : memref<1x1x32xf32, #tpu.memory_space<vmem>>, vector<1x1x32xf32>
    %111 = vector.shape_cast %110 : vector<1x1x32xf32> to vector<1x32xf32>
    %cst_55 = arith.constant dense<0.000000e+00> : vector<8xf32>
    %112 = vector.multi_reduction <add>, %107, %cst_55 [1] : vector<8x32xf32> to vector<8xf32>
    %113 = vector.shape_cast %112 : vector<8xf32> to vector<8x1xf32>
    %cst_56 = arith.constant 3.200000e+01 : f32
    %114 = vector.broadcast %cst_56 : f32 to vector<8x1xf32>
    %115 = arith.divf %113, %114 : vector<8x1xf32>
    %116 = vector.broadcast %115 : vector<8x1xf32> to vector<8x32xf32>
    %117 = arith.subf %107, %116 : vector<8x32xf32>
    %118 = arith.mulf %117, %117 : vector<8x32xf32>
    %cst_57 = arith.constant dense<0.000000e+00> : vector<8xf32>
    %119 = vector.multi_reduction <add>, %118, %cst_57 [1] : vector<8x32xf32> to vector<8xf32>
    %120 = vector.shape_cast %119 : vector<8xf32> to vector<8x1xf32>
    %cst_58 = arith.constant 3.200000e+01 : f32
    %121 = vector.broadcast %cst_58 : f32 to vector<8x1xf32>
    %122 = arith.divf %120, %121 : vector<8x1xf32>
    %cst_59 = arith.constant 9.99999974E-6 : f32
    %123 = vector.broadcast %cst_59 : f32 to vector<8x1xf32>
    %124 = arith.addf %122, %123 : vector<8x1xf32>
    %125 = math.rsqrt %124 : vector<8x1xf32>
    %126 = vector.broadcast %125 : vector<8x1xf32> to vector<8x32xf32>
    %127 = arith.mulf %117, %126 : vector<8x32xf32>
    %128 = vector.broadcast %109 : vector<1x32xf32> to vector<8x32xf32>
    %129 = arith.mulf %127, %128 : vector<8x32xf32>
    %130 = vector.broadcast %111 : vector<1x32xf32> to vector<8x32xf32>
    %131 = arith.addf %129, %130 : vector<8x32xf32>
    %c0_60 = arith.constant 0 : index
    %c0_61 = arith.constant 0 : index
    %132 = vector.load %arg16[%c0_60, %c0_61] : memref<8x32xf32, #tpu.memory_space<vmem>>, vector<8x32xf32>
    tpu.vector_store %arg16[%c0_60, %c0_61], %131 {strides = array<i32>} : memref<8x32xf32, #tpu.memory_space<vmem>>, vector<8x32xf32>,
    %c1_i32 = arith.constant 1 : i32
    %133 = arith.cmpi eq, %arg1, %c1_i32 : i32
    %134 = arith.extui %133 : i1 to i32
    %c0_i32_62 = arith.constant 0 : i32
    %135 = arith.cmpi ne, %134, %c0_i32_62 : i32
    scf.if %135 {
      %c0_63 = arith.constant 0 : index
      %c0_64 = arith.constant 0 : index
      %136 = vector.load %arg15[%c0_63, %c0_64] : memref<8x32xf32, #tpu.memory_space<vmem>>, vector<8x32xf32>
      tpu.vector_store %arg15[%c0_63, %c0_64], %131 {strides = array<i32>} : memref<8x32xf32, #tpu.memory_space<vmem>>, vector<8x32xf32>,
    } else {
    }
    return
  }
  func.func @transform_0(%arg0: i32, %arg1: i32) -> (i32, i32) {
    %c0_i32 = arith.constant 0 : i32
    %c0_i32_0 = arith.constant 0 : i32
    return %arg0, %c0_i32 : i32, i32
  }
  func.func @transform_1(%arg0: i32, %arg1: i32) -> (i32, i32, i32) {
    %c0_i32 = arith.constant 0 : i32
    %c0_i32_0 = arith.constant 0 : i32
    %c0_i32_1 = arith.constant 0 : i32
    return %arg1, %c0_i32, %c0_i32_0 : i32, i32, i32
  }
  func.func @transform_2(%arg0: i32, %arg1: i32) -> (i32, i32, i32) {
    %c0_i32 = arith.constant 0 : i32
    %c0_i32_0 = arith.constant 0 : i32
    %c0_i32_1 = arith.constant 0 : i32
    return %arg1, %c0_i32, %c0_i32_0 : i32, i32, i32
  }
  func.func @transform_3(%arg0: i32, %arg1: i32) -> (i32, i32, i32) {
    %c0_i32 = arith.constant 0 : i32
    %c0_i32_0 = arith.constant 0 : i32
    %c0_i32_1 = arith.constant 0 : i32
    return %arg1, %c0_i32, %c0_i32_0 : i32, i32, i32
  }
  func.func @transform_4(%arg0: i32, %arg1: i32) -> (i32, i32, i32) {
    %c0_i32 = arith.constant 0 : i32
    %c0_i32_0 = arith.constant 0 : i32
    %c0_i32_1 = arith.constant 0 : i32
    return %arg1, %c0_i32, %c0_i32_0 : i32, i32, i32
  }
  func.func @transform_5(%arg0: i32, %arg1: i32) -> (i32, i32, i32) {
    %c0_i32 = arith.constant 0 : i32
    %c0_i32_0 = arith.constant 0 : i32
    %c0_i32_1 = arith.constant 0 : i32
    return %arg1, %c0_i32, %c0_i32_0 : i32, i32, i32
  }
  func.func @transform_6(%arg0: i32, %arg1: i32) -> (i32, i32, i32) {
    %c0_i32 = arith.constant 0 : i32
    %c0_i32_0 = arith.constant 0 : i32
    %c0_i32_1 = arith.constant 0 : i32
    return %arg1, %c0_i32, %c0_i32_0 : i32, i32, i32
  }
  func.func @transform_7(%arg0: i32, %arg1: i32) -> (i32, i32, i32) {
    %c0_i32 = arith.constant 0 : i32
    %c0_i32_0 = arith.constant 0 : i32
    %c0_i32_1 = arith.constant 0 : i32
    return %arg1, %c0_i32, %c0_i32_0 : i32, i32, i32
  }
  func.func @transform_8(%arg0: i32, %arg1: i32) -> (i32, i32, i32) {
    %c0_i32 = arith.constant 0 : i32
    %c0_i32_0 = arith.constant 0 : i32
    %c0_i32_1 = arith.constant 0 : i32
    return %arg1, %c0_i32, %c0_i32_0 : i32, i32, i32
  }
  func.func @transform_9(%arg0: i32, %arg1: i32) -> (i32, i32, i32) {
    %c0_i32 = arith.constant 0 : i32
    %c0_i32_0 = arith.constant 0 : i32
    %c0_i32_1 = arith.constant 0 : i32
    return %arg1, %c0_i32, %c0_i32_0 : i32, i32, i32
  }
  func.func @transform_10(%arg0: i32, %arg1: i32) -> (i32, i32, i32) {
    %c0_i32 = arith.constant 0 : i32
    %c0_i32_0 = arith.constant 0 : i32
    %c0_i32_1 = arith.constant 0 : i32
    return %arg1, %c0_i32, %c0_i32_0 : i32, i32, i32
  }
  func.func @transform_11(%arg0: i32, %arg1: i32) -> (i32, i32, i32) {
    %c0_i32 = arith.constant 0 : i32
    %c0_i32_0 = arith.constant 0 : i32
    %c0_i32_1 = arith.constant 0 : i32
    return %arg1, %c0_i32, %c0_i32_0 : i32, i32, i32
  }
  func.func @transform_12(%arg0: i32, %arg1: i32) -> (i32, i32, i32) {
    %c0_i32 = arith.constant 0 : i32
    %c0_i32_0 = arith.constant 0 : i32
    %c0_i32_1 = arith.constant 0 : i32
    return %arg1, %c0_i32, %c0_i32_0 : i32, i32, i32
  }
  func.func @transform_13(%arg0: i32, %arg1: i32) -> (i32, i32) {
    %c0_i32 = arith.constant 0 : i32
    %c0_i32_0 = arith.constant 0 : i32
    return %arg0, %c0_i32 : i32, i32
  }
}

</mosaic_0001>

<bundles_post_ra>
// kernel: tpu_custom_call.1
= control target key start
LH: loop header
LB: loop body
LE: loop exit
PB: predicated region body
PF: predicated region fallthrough
CT: control target
= control target key end

     0   :  { %s3283_s0 = inlined_call_operand.hbm [shape: f32[16,32], index: 0, kind: input, shape index: {}]   ;;  %s3284_s1 = inlined_call_operand.vmem [shape: bf16[2,32,96], index: 1, kind: input, shape index: {}]   ;;  %s3285_s2 = inlined_call_operand.vmem [shape: f32[2,1,96], index: 2, kind: input, shape index: {}]   ;;  %s3286_s3 = inlined_call_operand.vmem [shape: bf16[2,32,32], index: 3, kind: input, shape index: {}]   ;;  %s3287_s4 = inlined_call_operand.vmem [shape: f32[2,1,32], index: 4, kind: input, shape index: {}]   ;;  %s3288_s5 = inlined_call_operand.vmem [shape: bf16[2,32,64], index: 5, kind: input, shape index: {}]   ;;  %s3289_s6 = inlined_call_operand.vmem [shape: f32[2,1,64], index: 6, kind: input, shape index: {}]   ;;  %s3290_s7 = inlined_call_operand.vmem [shape: bf16[2,64,32], index: 7, kind: input, shape index: {}]   ;;  %s3291_s8 = inlined_call_operand.vmem [shape: f32[2,1,32], index: 8, kind: input, shape index: {}]   ;;  %s3292_s9 = inlined_call_operand.vmem [shape: f32[2,1,32], index: 9, kind: input, shape index: {}]   ;;  %s3293_s10 = inlined_call_operand.vmem [shape: f32[2,1,32], index: 10, kind: input, shape index: {}]   ;;  %s3294_s11 = inlined_call_operand.vmem [shape: f32[2,1,32], index: 11, kind: input, shape index: {}]   ;;  %s3295_s12 = inlined_call_operand.vmem [shape: f32[2,1,32], index: 12, kind: input, shape index: {}]   ;;  %s3296_s13 = inlined_call_operand.hbm [shape: f32[16,32], index: 13, kind: output, shape index: {}]  }
   0x1   :  { %3311 = sst [smem:[#allocation22_spill]] %s3283_s0 }
   0x2   :  { %3312 = sst [smem:[#allocation23_spill]] %s3284_s1 }
   0x3   :  { %3313 = sst [smem:[#allocation24_spill]] %s3286_s3 }
   0x4   :  { %3314 = sst [smem:[#allocation25_spill]] %s3288_s5 }
   0x5   :  { %3315 = sst [smem:[#allocation26_spill]] %s3289_s6 }
   0x6   :  { %3316 = sst [smem:[#allocation27_spill]] %s3290_s7 }
   0x7   :  { %3317 = sst [smem:[#allocation28_spill]] %s3295_s12 }
   0x8   :  { %3318 = sst [smem:[#allocation29_spill]] %s3296_s13 }
   0x9   :  { %18 = vsyncpa [#allocation4], 0 }
   0xa   :  { %20 = vsyncpa [#allocation4 + $0x1], 0 }
   0xb   :  { %21 = vsyncpa [#allocation5], 0 }
   0xc   :  { %23 = vsyncpa [#allocation5 + $0x1], 0  ;;  %s2808_s25 = smov 0   ;;  %s2810_s26 = smov 0  }
   0xd   :  { %s2812_s27 = smov 0   ;;  %s2814_s28 = smov 0  }
   0xe   :  { %s2816_s29 = smov 0   ;;  %s2818_s30 = smov 0  }
   0xf   :  { %s2820_s14 = smov 0   ;;  %s2822_s15 = smov 0  }
  0x10 LB: > { %3319 = sst [smem:[#allocation9_spill]] %s2694_s25  ;;  %s2287_s16 = sadd.s32 4294967295, %s2722_s15   ;;  %s2722_s15 = sphi %s2822_s15, %s29_s15   ;;  %s2718_s14 = sphi %s2820_s14, %s3366_s14   ;;  %s2714_s30 = sphi %s2818_s30, %s3365_s30   ;;  %s2710_s29 = sphi %s2816_s29, %s3364_s29   ;;  %s2706_s28 = sphi %s2814_s28, %s3363_s28   ;;  %s2702_s27 = sphi %s2812_s27, %s3362_s27   ;;  %s2698_s26 = sphi %s2810_s26, %s3361_s26   ;;  %s2694_s25 = sphi %s2808_s25, %s3360_s25  }
  0x11   : > { %3320 = sst [smem:[#allocation10_spill]] %s2698_s26  ;;  %s2288_s17 = sadd.s32 4294967294, %s2722_s15  }
  0x12   : > { %3321 = sst [smem:[#allocation11_spill]] %s2702_s27  ;;  %s38_s18 = sadd.s32 1, %s2714_s30 }
  0x13   : > { %3322 = sst [smem:[#allocation12_spill]] %s2710_s29  ;;  %s41_s19 = sadd.s32 1, %s2718_s14 }
  0x14   : > { %3323 = sst [smem:[#allocation13_spill]] %s2714_s30  ;;  %p39_p0 = scmp.ge.s32.totalorder %s38_s18, 2 }
  0x15   : > { %3324 = sst [smem:[#allocation14_spill]] %s2718_s14  ;;  %s48_s20 = sadd.s32 1, %s2702_s27 }
  0x16   : > { %3325 = sst [smem:[#allocation15_spill]] %s2722_s15  ;;  %p55_p1 = scmp.ne.s32.totalorder %s2702_s27, %s2698_s26 }
  0x17   : > { %p56_p2 = scmp.eq.s32.totalorder %s2722_s15, 0  ;;  %s3368_s18 = smov (%p39_p0, %s38_s18), 0 }
  0x18   : > { %3326 = sst [smem:[#allocation16_spill]] %s3368_s18  ;;  %s3370_s19 = smov (!%p39_p0, %s41_s19), %s2718_s14 }
  0x19   : > { %p2859_p3 = por %p56_p2, %p55_p1  ;;  %p61_p4 = scmp.ne.s32.totalorder %s2698_s26, %s2694_s25 }
  0x1a   : > { %p43_p5 = scmp.ge.s32.totalorder %s3370_s19, 2  ;;  %p62_p6 = scmp.eq.s32.totalorder %s2287_s16, 0 }
  0x1b   : > { %p397_p7 = scmp.eq.s32.totalorder %s2287_s16, 3  ;;  %p403_p8 = scmp.eq.s32.totalorder %s2288_s17, 3 }
  0x1c   : > { %s3372_s19 = smov (%p43_p5, %s3370_s19), 0  ;;  %p2867_p9 = por %p62_p6, %p61_p4 }
  0x1d   : > { %3328 = sst [smem:[#allocation17_spill]] %s3372_s19  ;;  %p2871_p10 = por %p397_p7, %p55_p1 }
  0x1e   : > { %s45_s24 = ssub.s32 %s2718_s14, %s3372_s19  ;;  %p2877_p11 = por %p403_p8, %p61_p4 }
  0x1f   : > { %s3330_s23 = scalar_select %p2871_p10, 1, 0 }
  0x20   : > { %s3332_s18 = scalar_select %p2877_p11, 1, 0 }
  0x21   : > { %3331 = sst [smem:[#allocation18_spill]] %s3330_s23  ;;  %p46_p12 = scmp.eq.s32.totalorder %s45_s24, 0 }
  0x22   : > { %3333 = sst [smem:[#allocation19_spill]] %s3332_s18  ;;  %p2478_p13 = scmp.lt.s32.totalorder %s2722_s15, 4 }
  0x23   : > { %s423_s16 = sand.u32 1, %s2702_s27   ;;  %s2292_s25 = sshll.u32 %s2718_s14, 7 }
  0x24   : > { %s2884_s17 = scalar_select %p46_p12, %s2702_s27, %s48_s20  }
  0x25   : > { %s2291_s30 = sshll.u32 %s423_s16, 3  ;;  %s3335_s0 = sld [smem:[#allocation22_spill]] }
  0x26   : > { %3334 = sst [smem:[#allocation20_spill]] %s2884_s17  ;;  %s427_s19 = scalar_lea.vmem [#allocation3], %s2291_s30 }
  0x27   : > { %s434_s23 = sshll.u32 %s427_s19, 4  ;;  %p2896_p0 = pnand %p2478_p13, %p2859_p3  ;;  %s2892_s23 = int_to_ptr.vmem [resolvable:$true] %s434_s23 }
  0x28   : > { %s424_s13 = scalar_lea.sflag [#allocation4], %s423_s16 }
  0x29   : > { %p2596_p5 = pneg %p2896_p0 }
  0x2b   : > { %s2890_s12 = scalar_lea.hbm %s3335_s0, %s2292_s25  ;;  %s2599_s19 = scalar_lea.hbm %s3335_s0, 256 }
  0x2c   : > { %s2594_s25 = scalar_lea.hbm %s2890_s12, 128  ;;  %p2600_p3 = scmp.lt.u32.totalorder %s2890_s12, %s3335_s0 }
  0x2d   : > { %p2595_p4 = scmp.ne.s32.totalorder %s2890_s12, %s2594_s25  ;;  %p2601_p8 = scmp.lt.u32.totalorder %s2599_s19, %s2594_s25 }
  0x2e   : > { %p2603_p13 = scmp.lt.u32.totalorder %s2594_s25, %s2890_s12 }
  0x2f   : > { %p2597_p6 = pnand %p2596_p5, %p2595_p4  ;;  %p2602_p12 = por %p2601_p8, %p2600_p3 }
  0x31   : > { %p2598_p7 = pneg %p2597_p6  ;;  %p2604_p1 = por %p2603_p13, %p2602_p12 }
  0x33   : > { %p2605_p2 = pnand %p2604_p1, %p2598_p7 }
  0x35   : > { %2608 = shalt.err (!%p2605_p2)
}
  0x36   : > { %s2609_s16 = scalar_lea.vmem %s2892_s23, 128  ;;  %s2724_s29 = smov [#allocation3]  }
  0x37   : > { %p2610_p4 = scmp.ne.s32.totalorder %s2892_s23, %s2609_s16  ;;  %s2614_s30 = sshll.u32 %s2724_s29, 4  ;;  %s2615_s30 = int_to_ptr.vmem [resolvable:$false] %s2614_s30 }
  0x38   : > { %s2616_s20 = scalar_lea.vmem %s2615_s30, 256  ;;  %p2617_p10 = scmp.lt.s32.totalorder %s2892_s23, %s2615_s30 }
  0x39   : > { %p2612_p6 = pnand %p2610_p4, %p2596_p5  ;;  %p2618_p3 = scmp.lt.s32.totalorder %s2616_s20, %s2609_s16 }
  0x3b   : > { %p2613_p11 = pneg %p2612_p6  ;;  %p2619_p8 = por %p2618_p3, %p2617_p10 }
  0x3d   : > { %p2620_p12 = pnand %p2619_p8, %p2613_p11 }
  0x3f   : > { %2623 = shalt.err (!%p2620_p12)
}
  0x40   : > { %2473 = dma.hbm_to_vmem [thread:$0]  (!%p2896_p0), %s2890_s12, 128, %s2892_s23, %s424_s13  }
  0x41   : > { %p3337_p1 = scmp.lt.s32.totalorder %s2722_s15, 5  ;;  %p3338_p2 = scmp.ge.s32.totalorder %s2722_s15, 1 }
  0x43   : > { %p520_p5 = pnand %p3338_p2, %p3337_p1 }
  0x45   : > { %523 = sbr.rel (%p520_p5) target bundleno = 2671 (0xa6f), region = 72 }
  0x4c   : > { %s2932_s25 = sand.u32 1, %s2698_s26  }
  0x4d   : > { %3339 = sst [smem:[#allocation21_spill]] %s2932_s25  ;;  %s2294_s19 = sshll.u32 %s2932_s25, 3 }
  0x4e   : > { %s526_s21 = scalar_lea.sflag [#allocation4], %s2932_s25  ;;  %s529_s16 = scalar_lea.vmem [#allocation3], %s2294_s19 }
  0x4f   : > { %2685 = dma.done.wait (%p2867_p9), %s526_s21, 128  }
  0x50   : > { %2687 = vsyncadd (%p2867_p9), %s526_s21, 4294967168  ;;  %p616_p10 = scmp.lt.s32.totalorder %s2706_s28, 1  ;;  %s3340_s1 = sld [smem:[#allocation23_spill]] }
  0x51   : > { %s3341_s3 = sld [smem:[#allocation24_spill]]  ;;  %s3342_s5 = sld [smem:[#allocation25_spill]] }
  0x52   : > { %s2942_s12 = scalar_select %p616_p10, %s2706_s28, 1 }
  0x53   : > { %s3344_s7 = sld [smem:[#allocation27_spill]]  ;;  %p2304_p9 = scmp.ne.s32.totalorder %s2706_s28, 0 }
  0x54   : > { %s2348_s23 = sshll.u32 %s2942_s12, 4  ;;  %s2351_s29 = sshll.u32 %s2942_s12, 5  ;;  %v665_v0 = vld [vmem:[%s529_s16] sm:$0xff] (!%p2304_p9)  ;;  %vm666_vm0 = vcmask (!%p2304_p9), 261120  }
  0x55   : > { %s647_s27 = scalar_lea.vmem %s3291_s8, %s2942_s12  ;;  %s650_s15 = scalar_lea.vmem %s3292_s9, %s2942_s12  ;;  %667 = vst.msk [vmem:[#allocation2] sm:$0xff] (!%p2304_p9), %vm666_vm0, %v665_v0 }
  0x56   : > { %s620_s20 = scalar_lea.vmem %s3340_s1, %s2348_s23  ;;  %s656_s22 = scalar_lea.vmem %s3294_s11, %s2942_s12 }
  0x57   : > { %s2955_s14 = scalar_lea.vmem %s3341_s3, %s2348_s23  ;;  %s2964_s25 = scalar_lea.vmem %s3342_s5, %s2348_s23 }
  0x58   : > { %s653_s5 = scalar_lea.vmem %s3293_s10, %s2942_s12 }
  0x59   : > { %s2974_s0 = scalar_lea.vmem %s3344_s7, %s2351_s29  ;;  %s3345_s29 = sld [smem:[#allocation28_spill]] }
  0x5a   : > { %s2996_s7 = scalar_lea.vmem [#allocation6], %s2294_s19  ;;  %664 = sbr.rel (%p2304_p9) target bundleno = 97 (0x61), region = 80 }
  0x5f   : > { %s659_s30 = scalar_lea.vmem %s3345_s29, %s2942_s12 }
  0x61 PF: > { %v2556_v1 = vld [vmem:[%s620_s20] sm:$0xff]   ;;  %v2725_v2 = vmov 0.0   ;;  %v2557_v3 = vld [vmem:[%s620_s20 + $0x8] sm:$0xff]   ;;  %vm2726_vm1 = vmmov 0   ;;  %vm693_vm2 = vcmask 261120   ;;  %s3346_s26 = scalar_lea.vmem %s3285_s2, %s2942_s12  ;;  %s2727_s19 = smov 104   ;;  %v752_v17 = vlaneseq }
  0x62   : > { %2382 = vmatprep.subr.bf16.mxu0 %v2725_v2  ;;  %2390 = vmatprep.subr.bf16.mxu1 %v2725_v2  ;;  %v3003_v4 = vld [vmem:[#allocation2] sm:$0xff]  ;;  %s2728_s16 = smov 120   ;;  %s2729_s20 = smov 96   ;;  %v2732_v15 = vmov 1983009808   ;;  %vm1191_vm3 = vcmask 64512  }
  0x63   : > { %2383 = vmatpush3.bf16.msra.mxu0 %v2556_v1  ;;  %2386 = vmatprep.mubr.msk.bf16.mxu0 %vm2726_vm1, %v2725_v2  ;;  %v673_v5 = vpack.c.bf16 %v3003_v4, %v3003_v4  ;;  %v2305_v6 = vld [vmem:[%s3346_s26] ss:$0 sm:$0xff]  ;;  %s2730_s21 = smov 112   ;;  %s2731_s17 = smov 64   ;;  %v750_v16 = vunpack.c.l.s4 %v2732_v15  ;;  %v753_v19 = vshrl.u32 %v752_v17, 7  ;;  %vm1439_vm4 = vcmask 1043456  }
  0x64   : > { %2384 = vmatprep.subr.bf16.mxu0 %v2725_v2  ;;  %2392 = vmatprep.mubr.msk.bf16.mxu1 %vm2726_vm1, %v2725_v2  ;;  %v2733_v20 = vmov 1934713408   ;;  %s2735_s18 = smov 8   ;;  %s2736_s23 = smov 24   ;;  %vm1782_vm5 = vcmask 130048   ;;  %vm1784_vm6 = vcmask 195584  }
  0x65   : > { %v751_v18 = vunpack.c.0.s8 %v750_v16  ;;  %v782_v21 = vunpack.c.l.s4 %v2733_v20  ;;  %s3347_s1 = scalar_lea.vmem %s3287_s4, %s2942_s12  ;;  %vm1992_vm7 = vcmask 523264   ;;  %p2343_p11 = scmp.ne.s32.totalorder %s2706_s28, 1 }
  0x67   : > { %2385 = vmatpush3.bf16.msra.mxu0 %v2557_v3  ;;  %v3029_v24 = vsub.s32 %v751_v18, %v753_v19  ;;  %v783_v27 = vunpack.c.0.s8 %v782_v21 }
  0x68   : > { %2396 = vmatprep.subr.bf16.mxu0 %v2725_v2 }
  0x69   : > { %v3037_v34 = vsub.s32 %v783_v27, %v753_v19 }
  0x6a   : > { %2387 = vmatmul.mubr.msk.bf16.vlgmr.msra.gmra.mrb[0].mxu0 %vm693_vm2, %v673_v5 }
  0x6b   : > { %2398 = vmatprep.mubr.msk.bf16.mxu0 %vm2726_vm1, %v2725_v2 }
 0x13d   : > { %v731_v7 = vpop.f32.mrb[0].mxu0 }
 0x13e   : > { %v732_v8 = vadd.f32 %v2305_v6, %v731_v7  ;;  %v2388_v9 = vpop.f32.mrb[1].mxu0 }
 0x13f   : > { %v734_v10 = vpop.f32.mrb[2].mxu0 }
 0x140   : > { %744 = vrot.lane.b32.xlu1 %v732_v8, %s2727_s19  ;;  %738 = vrot.lane.b32.xlu0 %v732_v8, %s2728_s16  ;;  %v2389_v11 = vpop.f32.mrb[3].mxu0  ;;  %s3348_s19 = sld [smem:[#allocation26_spill]] }
 0x144   : > { %887 = vrot.lane.b32.xlu1 %v732_v8, %s2729_s20  ;;  %741 = vrot.lane.b32.xlu0 %v732_v8, %s2730_s21 }
 0x146   : > { %s3349_s16 = scalar_lea.vmem %s3348_s19, %s2942_s12 }
 0x1b2   : > { %v739_v12 = vpop.permute.xlu0 %738  ;;  %v3019_v13 = vpop.permute.xlu1 %744 }
 0x1b3   : > { %889 = vrot.lane.b32.xlu0 %v739_v12, %s2729_s20  ;;  %v763_v25 = vcombine.low %v739_v12, %v3019_v13  ;;  %v764_v26 = vcombine.high %v739_v12, %v3019_v13 }
 0x1b5   : > { %v771_v30 = vrot.slane %v763_v25, %v3029_v24  ;;  %v778_v31 = vrot.slane %v764_v26, %v3029_v24 }
 0x1b6   : > { %v3021_v14 = vpop.permute.xlu0 %741  ;;  %v888_v32 = vpop.permute.xlu1 %887 }
 0x1b7   : > { %893 = vrot.lane.b32.xlu0 %v3019_v13, %s2729_s20  ;;  %891 = vrot.lane.b32.xlu1 %v3021_v14, %s2729_s20  ;;  %v747_v22 = vcombine.low %v732_v8, %v3021_v14  ;;  %v748_v23 = vcombine.high %v732_v8, %v3021_v14 }
 0x1b9   : > { %v755_v28 = vrot.slane %v747_v22, %v3029_v24  ;;  %v762_v29 = vrot.slane %v748_v23, %v3029_v24 }
 0x1bb   : > { %1035 = vrot.lane.b32.xlu0 %v732_v8, %s2731_s17  ;;  %1037 = vrot.lane.b32.xlu1 %v739_v12, %s2731_s17  ;;  %v779_v35 = vcombine.low %v755_v28, %v771_v30  ;;  %v780_v36 = vcombine.high %v755_v28, %v771_v30  ;;  %v795_v37 = vcombine.low %v762_v29, %v778_v31 }
 0x1bc   : > { %v796_v38 = vcombine.high %v762_v29, %v778_v31 }
 0x1bd   : > { %v787_v45 = vrot.slane %v779_v35, %v3037_v34  ;;  %v794_v46 = vrot.slane %v780_v36, %v3037_v34  ;;  %v803_v47 = vrot.slane %v795_v37, %v3037_v34 }
 0x1be   : > { %v810_v48 = vrot.slane %v796_v38, %v3037_v34 }
 0x1bf   : > { %v815_v57 = vcombine.low %v787_v45, %v794_v46  ;;  %v2309_v58 = vcombine.high %v787_v45, %v794_v46 }
 0x1c0   : > { %v831_v59 = vcombine.low %v803_v47, %v810_v48  ;;  %v2310_v60 = vcombine.high %v803_v47, %v810_v48 }
 0x1c1   : > { %v822_v7 = vrot.slane %v815_v57, %v3029_v24  ;;  %v830_v8 = vrot.slane %v2309_v58, %v3029_v24 }
 0x1c2   : > { %v838_v9 = vrot.slane %v831_v59, %v3029_v24  ;;  %v846_v10 = vrot.slane %v2310_v60, %v3029_v24 }
 0x1c3   : > { %v847_v23 = vcombine.low %v822_v7, %v830_v8 }
 0x1c4   : > { %v863_v25 = vcombine.low %v838_v9, %v846_v10 }
 0x225   : > { %v890_v33 = vpop.permute.xlu0 %889 }
 0x229   : > { %v892_v39 = vpop.permute.xlu1 %891  ;;  %v894_v40 = vpop.permute.xlu0 %893 }
 0x22a   : > { %v899_v41 = vcombine.low %v888_v32, %v892_v39  ;;  %v900_v42 = vcombine.high %v888_v32, %v892_v39  ;;  %v915_v43 = vcombine.low %v890_v33, %v894_v40  ;;  %v916_v44 = vcombine.high %v890_v33, %v894_v40 }
 0x22b   : > { %v855_v32 = vrot.slane %v847_v23, %v3037_v34  ;;  %v871_v33 = vrot.slane %v863_v25, %v3037_v34  ;;  %v848_v39 = vcombine.high %v822_v7, %v830_v8  ;;  %v864_v40 = vcombine.high %v838_v9, %v846_v10 }
 0x22c   : > { %v907_v49 = vrot.slane %v899_v41, %v3029_v24  ;;  %v914_v50 = vrot.slane %v900_v42, %v3029_v24  ;;  %v923_v51 = vrot.slane %v915_v43, %v3029_v24  ;;  %v930_v52 = vrot.slane %v916_v44, %v3029_v24 }
 0x22d   : > { %v879_v41 = vcombine.low %v855_v32, %v871_v33  ;;  %v880_v42 = vcombine.high %v855_v32, %v871_v33  ;;  %v862_v47 = vrot.slane %v848_v39, %v3037_v34  ;;  %v878_v48 = vrot.slane %v864_v40, %v3037_v34 }
 0x22e   : > { %v931_v53 = vcombine.low %v907_v49, %v923_v51  ;;  %v932_v54 = vcombine.high %v907_v49, %v923_v51  ;;  %v947_v55 = vcombine.low %v914_v50, %v930_v52  ;;  %v948_v56 = vcombine.high %v914_v50, %v930_v52 }
 0x22f   : > { %v883_v45 = vpack.c.bf16 %v879_v41, %v879_v41  ;;  %v884_v46 = vpack.c.bf16 %v880_v42, %v880_v42  ;;  %v881_v51 = vcombine.low %v862_v47, %v878_v48  ;;  %v882_v52 = vcombine.high %v862_v47, %v878_v48 }
 0x230   : > { %v939_v61 = vrot.slane %v931_v53, %v3037_v34  ;;  %v946_v62 = vrot.slane %v932_v54, %v3037_v34  ;;  %v955_v63 = vrot.slane %v947_v55, %v3037_v34  ;;  %v962_v0 = vrot.slane %v948_v56, %v3037_v34 }
 0x231   : > { %v885_v53 = vpack.c.bf16 %v881_v51, %v881_v51  ;;  %v886_v54 = vpack.c.bf16 %v882_v52, %v882_v52 }
 0x232   : > { %v967_v1 = vcombine.low %v939_v61, %v946_v62  ;;  %v2311_v3 = vcombine.high %v939_v61, %v946_v62  ;;  %v983_v5 = vcombine.low %v955_v63, %v962_v0  ;;  %v2312_v6 = vcombine.high %v955_v63, %v962_v0 }
 0x234   : > { %v974_v11 = vrot.slane %v967_v1, %v3029_v24  ;;  %v982_v12 = vrot.slane %v2311_v3, %v3029_v24  ;;  %v990_v15 = vrot.slane %v983_v5, %v3029_v24  ;;  %v998_v16 = vrot.slane %v2312_v6, %v3029_v24 }
 0x236   : > { %v999_v17 = vcombine.low %v974_v11, %v982_v12  ;;  %v1015_v18 = vcombine.low %v990_v15, %v998_v16  ;;  %v1000_v19 = vcombine.high %v974_v11, %v982_v12  ;;  %v1016_v20 = vcombine.high %v990_v15, %v998_v16  ;;  %v1038_v15 = vpop.permute.xlu1 %1037  ;;  %v1036_v16 = vpop.permute.xlu0 %1035 }
 0x238   : > { %v1007_v21 = vrot.slane %v999_v17, %v3037_v34  ;;  %v1023_v22 = vrot.slane %v1015_v18, %v3037_v34  ;;  %v1014_v28 = vrot.slane %v1000_v19, %v3037_v34  ;;  %v1030_v29 = vrot.slane %v1016_v20, %v3037_v34 }
 0x23a   : > { %v1031_v26 = vcombine.low %v1007_v21, %v1023_v22  ;;  %v1032_v27 = vcombine.high %v1007_v21, %v1023_v22  ;;  %v1033_v37 = vcombine.low %v1014_v28, %v1030_v29  ;;  %v1034_v38 = vcombine.high %v1014_v28, %v1030_v29 }
 0x23c   : > { %v1183_v30 = vpack.c.bf16 %v1031_v26, %v1031_v26  ;;  %v1184_v31 = vpack.c.bf16 %v1032_v27, %v1032_v27  ;;  %v1185_v43 = vpack.c.bf16 %v1033_v37, %v1033_v37  ;;  %v1186_v44 = vpack.c.bf16 %v1034_v38, %v1034_v38 }
 0x23e   : > { %v1196_v35 = vsel %vm1191_vm3, %v1183_v30, 0  ;;  %v1242_v36 = vsel %vm1191_vm3, %v1184_v31, 0  ;;  %v1288_v49 = vsel %vm1191_vm3, %v1185_v43, 0  ;;  %v1334_v50 = vsel %vm1191_vm3, %v1186_v44, 0 }
 0x23f   : > { %2391 = vmatpush3.bf16.xpose.msra.mxu1 %v1196_v35  ;;  %2397 = vmatpush3.bf16.xpose.msra.mxu0 %v1242_v36 }
 0x240   : > { %2402 = vmatprep.subr.bf16.mxu1 %v2725_v2  ;;  %2408 = vmatprep.subr.bf16.mxu0 %v2725_v2 }
 0x246   : > { %2393 = vmatmul.mubr.msk.bf16.vlgmr.msra.gmra.mrb[0].mxu1 %vm1191_vm3, %v883_v45  ;;  %2399 = vmatmul.mubr.msk.bf16.vlgmr.msra.gmra.mrb[4].mxu0 %vm1191_vm3, %v884_v46 }
 0x247   : > { %2403 = vmatpush3.bf16.xpose.msra.mxu1 %v1288_v49  ;;  %2409 = vmatpush3.bf16.xpose.msra.mxu0 %v1334_v50 }
 0x248   : > { %2404 = vmatprep.mubr.msk.bf16.mxu1 %vm2726_vm1, %v2725_v2  ;;  %2410 = vmatprep.mubr.msk.bf16.mxu0 %vm2726_vm1, %v2725_v2 }
 0x249   : > { %2414 = vmatprep.subr.bf16.mxu1 %v2725_v2  ;;  %2420 = vmatprep.subr.bf16.mxu0 %v2725_v2 }
 0x24e   : > { %2405 = vmatmul.mubr.msk.bf16.vlgmr.msra.gmra.mrb[4].mxu1 %vm1191_vm3, %v885_v53  ;;  %2411 = vmatmul.mubr.msk.bf16.vlgmr.msra.gmra.mrb[8].mxu0 %vm1191_vm3, %v886_v54 }
 0x24f   : > { %2416 = vmatprep.mubr.msk.bf16.mxu1 %vm2726_vm1, %v2725_v2  ;;  %2422 = vmatprep.mubr.msk.bf16.mxu0 %vm2726_vm1, %v2725_v2 }
 0x319   : > { %v1232_v55 = vpop.f32.mrb[0].mxu1  ;;  %v1278_v56 = vpop.f32.mrb[4].mxu0 }
 0x31a   : > { %v2394_v57 = vpop.f32.mrb[1].mxu1  ;;  %v2400_v58 = vpop.f32.mrb[5].mxu0  ;;  %v1376_v59 = vsel %vm1191_vm3, %v1232_v55, -inf  ;;  %v1379_v60 = vsel %vm1191_vm3, %v1278_v56, -inf }
 0x31b   : > { %1377 = vmax.xlane.f32.xlu1 %v1376_v59  ;;  %v1235_v61 = vpop.f32.mrb[2].mxu1  ;;  %1380 = vmax.xlane.f32.xlu0 %v1379_v60  ;;  %v1281_v62 = vpop.f32.mrb[6].mxu0 }
 0x31c   : > { %v2395_v63 = vpop.f32.mrb[3].mxu1  ;;  %v2401_v0 = vpop.f32.mrb[7].mxu0 }
 0x321   : > { %v3089_v1 = vpop.f32.mrb[4].mxu1  ;;  %v3091_v3 = vpop.f32.mrb[8].mxu0 }
 0x322   : > { %v2406_v5 = vpop.f32.mrb[5].mxu1  ;;  %v2412_v6 = vpop.f32.mrb[9].mxu0  ;;  %v1382_v11 = vsel %vm1191_vm3, %v3089_v1, -inf  ;;  %v1385_v12 = vsel %vm1191_vm3, %v3091_v3, -inf }
 0x323   : > { %v1327_v7 = vpop.f32.mrb[6].mxu1  ;;  %v1373_v8 = vpop.f32.mrb[10].mxu0 }
 0x324   : > { %v2407_v9 = vpop.f32.mrb[7].mxu1  ;;  %v2413_v10 = vpop.f32.mrb[11].mxu0 }
 0x32c   : > { %1039 = vrot.lane.b32.xlu1 %v3021_v14, %s2731_s17 }
 0x331   : > { %1041 = vrot.lane.b32.xlu0 %v3019_v13, %s2731_s17 }
 0x350   : > { %1383 = vmax.xlane.f32.xlu1 %v1382_v11  ;;  %1386 = vmax.xlane.f32.xlu0 %v1385_v12 }
 0x3a8   : > { %v3101_v17 = vpop.xlane.xlu1 %1377  ;;  %v3103_v18 = vpop.xlane.xlu0 %1380 }
 0x3a9   : > { %v1400_v19 = vsub.f32 %v1232_v55, %v3101_v17  ;;  %v1401_v14 = vsub.f32 %v1278_v56, %v3103_v18 }
 0x3ab   : > { %v1404_v20 = vmul.f32 1.442695, %v1400_v19  ;;  %v1406_v13 = vmul.f32 1.442695, %v1401_v14 }
 0x3ac   : > { %v1040_v21 = vpop.permute.xlu1 %1039  ;;  %v1042_v22 = vpop.permute.xlu0 %1041 }
 0x3ad   : > { %v1047_v23 = vcombine.low %v1036_v16, %v1040_v21  ;;  %v1048_v25 = vcombine.high %v1036_v16, %v1040_v21  ;;  %v1063_v26 = vcombine.low %v1038_v15, %v1042_v22  ;;  %2566 = vpow2.f32 %v1404_v20 }
 0x3ae   : > { %v1064_v27 = vcombine.high %v1038_v15, %v1042_v22  ;;  %2568 = vpow2.f32 %v1406_v13 }
 0x3af   : > { %v1055_v28 = vrot.slane %v1047_v23, %v3029_v24  ;;  %v1062_v29 = vrot.slane %v1048_v25, %v3029_v24  ;;  %v1071_v30 = vrot.slane %v1063_v26, %v3029_v24 }
 0x3b0   : > { %v1078_v31 = vrot.slane %v1064_v27, %v3029_v24 }
 0x3b1   : > { %v1079_v32 = vcombine.low %v1055_v28, %v1071_v30  ;;  %v1080_v33 = vcombine.high %v1055_v28, %v1071_v30 }
 0x3b2   : > { %v1095_v35 = vcombine.low %v1062_v29, %v1078_v31  ;;  %v1096_v36 = vcombine.high %v1062_v29, %v1078_v31 }
 0x3b3   : > { %v1087_v37 = vrot.slane %v1079_v32, %v3037_v34  ;;  %v1094_v38 = vrot.slane %v1080_v33, %v3037_v34 }
 0x3b4   : > { %v1103_v39 = vrot.slane %v1095_v35, %v3037_v34  ;;  %v1110_v40 = vrot.slane %v1096_v36, %v3037_v34 }
 0x3b5   : > { %v1115_v41 = vcombine.low %v1087_v37, %v1094_v38  ;;  %v2313_v42 = vcombine.high %v1087_v37, %v1094_v38 }
 0x3b6   : > { %v1131_v43 = vcombine.low %v1103_v39, %v1110_v40  ;;  %v2314_v44 = vcombine.high %v1103_v39, %v1110_v40 }
 0x3b7   : > { %v1122_v45 = vrot.slane %v1115_v41, %v3029_v24  ;;  %v1130_v46 = vrot.slane %v2313_v42, %v3029_v24  ;;  %v2567_v47 = vpop.eup %2566 }
 0x3b8   : > { %v1138_v48 = vrot.slane %v1131_v43, %v3029_v24  ;;  %v1146_v49 = vrot.slane %v2314_v44, %v3029_v24  ;;  %v1416_v50 = vsel %vm1191_vm3, %v2567_v47, 0.0  ;;  %v2569_v53 = vpop.eup %2568  ;;  %v1432_v11 = vpack.c.bf16 %v2567_v47, %v2567_v47 }
 0x3b9   : > { %v1147_v51 = vcombine.low %v1122_v45, %v1130_v46  ;;  %v1148_v52 = vcombine.high %v1122_v45, %v1130_v46  ;;  %1417 = vadd.xlane.f32.xlu0 %v1416_v50  ;;  %v1419_v56 = vsel %vm1191_vm3, %v2569_v53, 0.0  ;;  %v1433_v12 = vpack.c.bf16 %v2569_v53, %v2569_v53 }
 0x3ba   : > { %v1163_v54 = vcombine.low %v1138_v48, %v1146_v49  ;;  %v1164_v55 = vcombine.high %v1138_v48, %v1146_v49  ;;  %1420 = vadd.xlane.f32.xlu1 %v1419_v56 }
 0x3bb   : > { %v1155_v57 = vrot.slane %v1147_v51, %v3037_v34  ;;  %v1162_v58 = vrot.slane %v1148_v52, %v3037_v34 }
 0x3bc   : > { %v1171_v59 = vrot.slane %v1163_v54, %v3037_v34  ;;  %v1178_v60 = vrot.slane %v1164_v55, %v3037_v34 }
 0x3be   : > { %v1179_v61 = vcombine.low %v1155_v57, %v1171_v59  ;;  %v1180_v62 = vcombine.high %v1155_v57, %v1171_v59  ;;  %v1181_v63 = vcombine.low %v1162_v58, %v1178_v60  ;;  %v1182_v0 = vcombine.high %v1162_v58, %v1178_v60 }
 0x3c0   : > { %v1187_v5 = vpack.c.bf16 %v1179_v61, %v1179_v61  ;;  %v1188_v6 = vpack.c.bf16 %v1180_v62, %v1180_v62  ;;  %v1189_v9 = vpack.c.bf16 %v1181_v63, %v1181_v63  ;;  %v1190_v10 = vpack.c.bf16 %v1182_v0, %v1182_v0 }
 0x3c2   : > { %v1441_v7 = vsel %vm1439_vm4, %v1187_v5, 0  ;;  %v1487_v8 = vsel %vm1439_vm4, %v1188_v6, 0  ;;  %v1533_v15 = vsel %vm1439_vm4, %v1189_v9, 0  ;;  %v1579_v16 = vsel %vm1439_vm4, %v1190_v10, 0 }
 0x3c3   : > { %2415 = vmatpush3.bf16.msra.mxu1 %v1441_v7  ;;  %2421 = vmatpush3.bf16.msra.mxu0 %v1487_v8 }
 0x3c4   : > { %2426 = vmatprep.subr.bf16.mxu1 %v2725_v2  ;;  %2432 = vmatprep.subr.bf16.mxu0 %v2725_v2 }
 0x3c6   : > { %2417 = vmatmul.mubr.msk.bf16.vlgmr.msra.gmra.mrb[8].mxu1 %vm1191_vm3, %v1432_v11  ;;  %2423 = vmatmul.mubr.msk.bf16.vlgmr.msra.gmra.mrb[12].mxu0 %vm1191_vm3, %v1433_v12 }
 0x3c7   : > { %2427 = vmatpush3.bf16.msra.mxu1 %v1533_v15  ;;  %2433 = vmatpush3.bf16.msra.mxu0 %v1579_v16 }
 0x3c8   : > { %2428 = vmatprep.mubr.msk.bf16.mxu1 %vm2726_vm1, %v2725_v2  ;;  %2434 = vmatprep.mubr.msk.bf16.mxu0 %vm2726_vm1, %v2725_v2 }
 0x3c9   : > { %2438 = vmatprep.subr.bf16.mxu1 %v2725_v2  ;;  %2446 = vmatprep.subr.bf16.mxu0 %v2725_v2 }
 0x3dd   : > { %v1384_v19 = vpop.xlane.xlu1 %1383  ;;  %v1387_v14 = vpop.xlane.xlu0 %1386 }
 0x3de   : > { %v1402_v20 = vsub.f32 %v3089_v1, %v1384_v19  ;;  %v1403_v13 = vsub.f32 %v3091_v3, %v1387_v14  ;;  %v1388_v1 = vsub.f32 -inf, %v3101_v17  ;;  %v1389_v3 = vsub.f32 -inf, %v3103_v18 }
 0x3df   : > { %v1390_v53 = vsub.f32 -inf, %v1384_v19  ;;  %v1391_v54 = vsub.f32 -inf, %v1387_v14 }
 0x3e0   : > { %v1408_v21 = vmul.f32 1.442695, %v1402_v20  ;;  %v1410_v22 = vmul.f32 1.442695, %v1403_v13  ;;  %v1392_v30 = vmul.f32 1.442695, %v1388_v1 }
 0x3e1   : > { %v1394_v31 = vmul.f32 1.442695, %v1389_v3  ;;  %v1396_v55 = vmul.f32 1.442695, %v1390_v53  ;;  %v1398_v56 = vmul.f32 1.442695, %v1391_v54 }
 0x3e2   : > { %2570 = vpow2.f32 %v1408_v21  ;;  %v2558_v1 = vld [vmem:[%s2955_s14] sm:$0xff]  }
 0x3e3   : > { %2572 = vpow2.f32 %v1410_v22 }
 0x3e4   : > { %2574 = vpow2.f32 %v1392_v30 }
 0x3e5   : > { %2576 = vpow2.f32 %v1394_v31 }
 0x3ec   : > { %v2571_v23 = vpop.eup %2570 }
 0x3ed   : > { %v1422_v25 = vsel %vm1191_vm3, %v2571_v23, 0.0  ;;  %v1434_v26 = vpack.c.bf16 %v2571_v23, %v2571_v23  ;;  %v2573_v27 = vpop.eup %2572 }
 0x3ee   : > { %1423 = vadd.xlane.f32.xlu0 %v1422_v25  ;;  %v1425_v28 = vsel %vm1191_vm3, %v2573_v27, 0.0  ;;  %v1435_v29 = vpack.c.bf16 %v2573_v27, %v2573_v27  ;;  %v2575_v32 = vpop.eup %2574 }
 0x3ef   : > { %2429 = vmatmul.mubr.msk.bf16.vlgmr.msra.gmra.mrb[12].mxu1 %vm1191_vm3, %v1434_v26  ;;  %1426 = vadd.xlane.f32.xlu1 %v1425_v28  ;;  %v2577_v33 = vpop.eup %2576  ;;  %v1412_v37 = vmul.f32 0.0, %v2575_v32 }
 0x3f0   : > { %2442 = vmatprep.mubr.msk.bf16.mxu1 %vm2726_vm1, %v2725_v2  ;;  %2435 = vmatmul.mubr.msk.bf16.vlgmr.msra.gmra.mrb[16].mxu0 %vm1191_vm3, %v1435_v29  ;;  %v1413_v38 = vmul.f32 0.0, %v2577_v33 }
 0x3f1   : > { %2450 = vmatprep.mubr.msk.bf16.mxu0 %vm2726_vm1, %v2725_v2  ;;  %2439 = vmatpush3.bf16.msra.mxu1 %v2558_v1 }
 0x3f2   : > { %2440 = vmatprep.subr.bf16.mxu1 %v2725_v2 }
 0x446   : > { %v1418_v35 = vpop.xlane.xlu0 %1417 }
 0x447   : > { %v1421_v36 = vpop.xlane.xlu1 %1420  ;;  %v1428_v39 = vadd.f32 %v1418_v35, %v1412_v37 }
 0x448   : > { %v1429_v40 = vadd.f32 %v1421_v36, %v1413_v38 }
 0x449   : > { %2578 = vrcp.f32 %v1428_v39 }
 0x44a   : > { %2580 = vrcp.f32 %v1429_v40 }
 0x44b   : > { %2582 = vpow2.f32 %v1396_v55 }
 0x44c   : > { %2584 = vpow2.f32 %v1398_v56 }
 0x453   : > { %v2579_v43 = vpop.eup %2578 }
 0x454   : > { %v2581_v46 = vpop.eup %2580 }
 0x455   : > { %v2583_v57 = vpop.eup %2582 }
 0x456   : > { %v2585_v58 = vpop.eup %2584  ;;  %v1414_v60 = vmul.f32 0.0, %v2583_v57 }
 0x457   : > { %v1415_v62 = vmul.f32 0.0, %v2585_v58 }
 0x47b   : > { %v1424_v59 = vpop.xlane.xlu0 %1423 }
 0x47c   : > { %v1427_v61 = vpop.xlane.xlu1 %1426  ;;  %v1430_v63 = vadd.f32 %v1424_v59, %v1414_v60 }
 0x47d   : > { %v1431_v0 = vadd.f32 %v1427_v61, %v1415_v62 }
 0x47e   : > { %2586 = vrcp.f32 %v1430_v63 }
 0x47f   : > { %2588 = vrcp.f32 %v1431_v0 }
 0x488   : > { %v2587_v8 = vpop.eup %2586 }
 0x489   : > { %v2589_v19 = vpop.eup %2588 }
 0x499   : > { %v1477_v41 = vpop.f32.mrb[8].mxu1  ;;  %v1523_v42 = vpop.f32.mrb[12].mxu0 }
 0x49a   : > { %v1621_v17 = vadd.f32 %v1477_v41, %v1412_v37  ;;  %v1622_v44 = vadd.f32 %v1523_v42, %v1413_v38  ;;  %v2418_v18 = vpop.f32.mrb[9].mxu1  ;;  %v2424_v45 = vpop.f32.mrb[13].mxu0  ;;  %v2559_v38 = vld [vmem:[%s2955_s14 + $0x8] sm:$0xff]   ;;  %s2734_s14 = smov 16  }
 0x49b   : > { %v1480_v47 = vpop.f32.mrb[10].mxu1  ;;  %v1526_v48 = vpop.f32.mrb[14].mxu0  ;;  %2441 = vmatpush3.bf16.msra.mxu1 %v2559_v38 }
 0x49c   : > { %v1629_v49 = vmul.f32 %v2579_v43, %v1621_v17  ;;  %v1630_v50 = vmul.f32 %v2581_v46, %v1622_v44  ;;  %v2419_v51 = vpop.f32.mrb[11].mxu1  ;;  %v2425_v52 = vpop.f32.mrb[15].mxu0  ;;  %2454 = vmatprep.subr.bf16.mxu1 %v2725_v2 }
 0x4c2   : > { %v1569_v5 = vpop.f32.mrb[12].mxu1 }
 0x4c3   : > { %v1623_v6 = vadd.f32 %v1569_v5, %v1414_v60  ;;  %v2430_v7 = vpop.f32.mrb[13].mxu1  ;;  %v1615_v9 = vpop.f32.mrb[16].mxu0 }
 0x4c4   : > { %v1572_v10 = vpop.f32.mrb[14].mxu1  ;;  %v1624_v12 = vadd.f32 %v1615_v9, %v1415_v62  ;;  %v2436_v15 = vpop.f32.mrb[17].mxu0  ;;  %v2325_v62 = vld [vmem:[%s3347_s1] ss:$0 sm:$0xff] }
 0x4c5   : > { %v1631_v11 = vmul.f32 %v2587_v8, %v1623_v6  ;;  %v2431_v16 = vpop.f32.mrb[15].mxu1  ;;  %v1618_v14 = vpop.f32.mrb[18].mxu0 }
 0x4c6   : > { %v1632_v21 = vmul.f32 %v2589_v19, %v1624_v12  ;;  %v2437_v22 = vpop.f32.mrb[19].mxu0  ;;  %v2560_v19 = vld [vmem:[%s2964_s25] sm:$0xff]   ;;  %v2561_v14 = vld [vmem:[%s2964_s25 + $0x8] sm:$0xff]  }
 0x4c7   : > { %v1633_v20 = vcombine.low %v1629_v49, %v1631_v11  ;;  %v1634_v13 = vcombine.high %v1629_v49, %v1631_v11  ;;  %2447 = vmatpush3.bf16.msra.mxu0 %v2560_v19 }
 0x4c8   : > { %v1649_v26 = vcombine.low %v1630_v50, %v1632_v21  ;;  %v1650_v27 = vcombine.high %v1630_v50, %v1632_v21  ;;  %2448 = vmatprep.subr.bf16.mxu0 %v2725_v2 }
 0x4c9   : > { %v1641_v23 = vrot.slane %v1633_v20, %v3029_v24  ;;  %v1648_v25 = vrot.slane %v1634_v13, %v3029_v24  ;;  %v2563_v20 = vld [vmem:[%s2974_s0 + $0x8] sm:$0xff]  }
 0x4ca   : > { %v1657_v28 = vrot.slane %v1649_v26, %v3029_v24  ;;  %v1664_v29 = vrot.slane %v1650_v27, %v3029_v24  ;;  %v2330_v27 = vld [vmem:[%s653_s5] ss:$0 sm:$0xff] }
 0x4cb   : > { %2449 = vmatpush3.bf16.msra.mxu0 %v2561_v14 }
 0x4cc   : > { %v1665_v3 = vcombine.low %v1641_v23, %v1657_v28  ;;  %v1666_v30 = vcombine.high %v1641_v23, %v1657_v28  ;;  %v1681_v31 = vcombine.low %v1648_v25, %v1664_v29  ;;  %v1682_v32 = vcombine.high %v1648_v25, %v1664_v29  ;;  %v2329_v25 = vld [vmem:[%s650_s15] ss:$0 sm:$0xff] }
 0x4ce   : > { %v1673_v33 = vrot.slane %v1665_v3, %v3037_v34  ;;  %v1680_v35 = vrot.slane %v1666_v30, %v3037_v34  ;;  %v1689_v36 = vrot.slane %v1681_v31, %v3037_v34  ;;  %v1696_v37 = vrot.slane %v1682_v32, %v3037_v34  ;;  %v2564_v3 = vld [vmem:[%s2974_s0 + $0x10] sm:$0xff]   ;;  %v2565_v30 = vld [vmem:[%s2974_s0 + $0x18] sm:$0xff]   ;;  %v2331_v31 = vld [vmem:[%s3349_s16] ss:$0 sm:$0xff] }
 0x4d0   : > { %v1701_v39 = vcombine.low %v1673_v33, %v1680_v35  ;;  %v2323_v40 = vcombine.high %v1673_v33, %v1680_v35  ;;  %v1717_v41 = vcombine.low %v1689_v36, %v1696_v37  ;;  %v2324_v42 = vcombine.high %v1689_v36, %v1696_v37 }
 0x4d2   : > { %v1708_v43 = vrot.slane %v1701_v39, %v3029_v24  ;;  %v1716_v17 = vrot.slane %v2323_v40, %v3029_v24  ;;  %v1724_v44 = vrot.slane %v1717_v41, %v3029_v24  ;;  %v1732_v18 = vrot.slane %v2324_v42, %v3029_v24 }
 0x4d4   : > { %v1734_v45 = vcombine.high %v1708_v43, %v1716_v17  ;;  %v1750_v46 = vcombine.high %v1724_v44, %v1732_v18  ;;  %v1733_v47 = vcombine.low %v1708_v43, %v1716_v17  ;;  %v1749_v48 = vcombine.low %v1724_v44, %v1732_v18 }
 0x4d6   : > { %v1748_v49 = vrot.slane %v1734_v45, %v3037_v34  ;;  %v1764_v50 = vrot.slane %v1750_v46, %v3037_v34  ;;  %v1741_v51 = vrot.slane %v1733_v47, %v3037_v34  ;;  %v1757_v52 = vrot.slane %v1749_v48, %v3037_v34 }
 0x4d8   : > { %v1767_v53 = vcombine.low %v1748_v49, %v1764_v50  ;;  %v1766_v54 = vcombine.high %v1741_v51, %v1757_v52  ;;  %v1768_v55 = vcombine.high %v1748_v49, %v1764_v50  ;;  %v1765_v56 = vcombine.low %v1741_v51, %v1757_v52 }
 0x4da   : > { %1774 = vrot.lane.b32.xlu1 %v1767_v53, %s2734_s14  ;;  %1770 = vrot.lane.b32.xlu0 %v1766_v54, %s2735_s18  ;;  %v2341_v54 = vld [vmem:[%s656_s22] ss:$0 sm:$0xff] }
 0x4de   : > { %1778 = vrot.lane.b32.xlu1 %v1768_v55, %s2736_s23 }
 0x54c   : > { %v1775_v24 = vpop.permute.xlu1 %1774  ;;  %v1771_v57 = vpop.permute.xlu0 %1770 }
 0x54d   : > { %v1781_v58 = vsel %vm1191_vm3, %v1765_v56, %v1771_v57  ;;  %v2342_v56 = vld [vmem:[%s659_s30] ss:$0 sm:$0xff] }
 0x54e   : > { %v1783_v60 = vsel %vm1782_vm5, %v1781_v58, %v1775_v24 }
 0x550   : > { %v1779_v59 = vpop.permute.xlu1 %1778 }
 0x551   : > { %v1785_v34 = vsel %vm1784_vm6, %v1783_v60, %v1779_v59 }
 0x552   : > { %v1790_v61 = vpack.c.bf16 %v1785_v34, %v1785_v34 }
 0x554   : > { %2443 = vmatmul.mubr.msk.bf16.vlgmr.msra.gmra.mrb[16].mxu1 %vm693_vm2, %v1790_v61 }
 0x555   : > { %2462 = vmatprep.mubr.msk.bf16.mxu1 %vm2726_vm1, %v2725_v2 }
 0x627   : > { %v1847_v63 = vpop.f32.mrb[16].mxu1 }
 0x628   : > { %v1848_v0 = vadd.f32 %v2325_v62, %v1847_v63  ;;  %v2444_v5 = vpop.f32.mrb[17].mxu1 }
 0x629   : > { %v1850_v6 = vpop.f32.mrb[18].mxu1 }
 0x62a   : > { %v2445_v7 = vpop.f32.mrb[19].mxu1  ;;  %v1853_v8 = vadd.f32 %v1848_v0, %v3003_v4  ;;  %v2562_v4 = vld [vmem:[%s2974_s0] sm:$0xff]  }
 0x62b   : > { %2455 = vmatpush3.bf16.msra.mxu1 %v2562_v4 }
 0x62c   : > { %v1856_v9 = vsel %vm693_vm2, %v1853_v8, 0.0  ;;  %2456 = vmatprep.subr.bf16.mxu1 %v2725_v2 }
 0x62d   : > { %1857 = vadd.xlane.f32.xlu0 %v1856_v9 }
 0x62f   : > { %2457 = vmatpush3.bf16.msra.mxu1 %v2563_v20 }
 0x630   : > { %2458 = vmatprep.subr.bf16.mxu1 %v2725_v2 }
 0x633   : > { %2459 = vmatpush3.bf16.msra.mxu1 %v2564_v3 }
 0x634   : > { %2460 = vmatprep.subr.bf16.mxu1 %v2725_v2  ;;  %v2335_v2 = vld [vmem:[%s647_s27] ss:$0 sm:$0xff] }
 0x637   : > { %2461 = vmatpush3.bf16.msra.mxu1 %v2565_v30 }
 0x6ba   : > { %v1858_v10 = vpop.xlane.xlu0 %1857 }
 0x6bb   : > { %v1860_v11 = vmul.f32 0.03125, %v1858_v10 }
 0x6bd   : > { %v1861_v12 = vsub.f32 %v1853_v8, %v1860_v11 }
 0x6bf   : > { %v1862_v15 = vmul.f32 %v1861_v12, %v1861_v12 }
 0x6c1   : > { %v1863_v16 = vsel %vm693_vm2, %v1862_v15, 0.0 }
 0x6c2   : > { %1864 = vadd.xlane.f32.xlu1 %v1863_v16 }
 0x74f   : > { %v1865_v13 = vpop.xlane.xlu1 %1864 }
 0x750   : > { %v1866_v21 = vmul.f32 0.03125, %v1865_v13 }
 0x752   : > { %v1867_v22 = vadd.f32 1e-05, %v1866_v21 }
 0x754   : > { %2590 = vrsqrt.f32 %v1867_v22 }
 0x75e   : > { %v2591_v23 = vpop.eup %2590 }
 0x75f   : > { %v1869_v26 = vmul.f32 %v2591_v23, %v1861_v12 }
 0x761   : > { %v1876_v28 = vmul.f32 %v2329_v25, %v1869_v26 }
 0x763   : > { %v1883_v29 = vadd.f32 %v2330_v27, %v1876_v28 }
 0x765   : > { %v1897_v1 = vpack.c.bf16 %v1883_v29, %v1883_v29 }
 0x767   : > { %2451 = vmatmul.mubr.msk.bf16.vlgmr.msra.gmra.mrb[20].mxu0 %vm693_vm2, %v1897_v1 }
 0x83a   : > { %v1953_v32 = vpop.f32.mrb[20].mxu0 }
 0x83b   : > { %v1954_v33 = vadd.f32 %v2331_v31, %v1953_v32  ;;  %v2452_v35 = vpop.f32.mrb[21].mxu0 }
 0x83c   : > { %v1956_v36 = vpop.f32.mrb[22].mxu0 }
 0x83d   : > { %v1959_v37 = vmax.f32 %v1954_v33, 0.0  ;;  %v2453_v38 = vpop.f32.mrb[23].mxu0 }
 0x83f   : > { %v1960_v39 = vpack.c.bf16 %v1959_v37, %v1959_v37 }
 0x841   : > { %2463 = vmatmul.mubr.msk.bf16.vlgmr.msra.gmra.mrb[20].mxu1 %vm1992_vm7, %v1960_v39 }
 0x914   : > { %v2030_v40 = vpop.f32.mrb[20].mxu1 }
 0x915   : > { %v2031_v41 = vadd.f32 %v2335_v2, %v2030_v40  ;;  %v2464_v42 = vpop.f32.mrb[21].mxu1 }
 0x916   : > { %v2033_v43 = vpop.f32.mrb[22].mxu1 }
 0x917   : > { %v2465_v17 = vpop.f32.mrb[23].mxu1  ;;  %v2036_v44 = vadd.f32 %v2031_v41, %v1883_v29 }
 0x919   : > { %v2039_v18 = vsel %vm693_vm2, %v2036_v44, 0.0 }
 0x91a   : > { %2040 = vadd.xlane.f32.xlu0 %v2039_v18 }
 0x9a7   : > { %v2041_v45 = vpop.xlane.xlu0 %2040 }
 0x9a8   : > { %v2042_v46 = vmul.f32 0.03125, %v2041_v45 }
 0x9aa   : > { %v2043_v47 = vsub.f32 %v2036_v44, %v2042_v46 }
 0x9ac   : > { %v2044_v48 = vmul.f32 %v2043_v47, %v2043_v47 }
 0x9ae   : > { %v2045_v49 = vsel %vm693_vm2, %v2044_v48, 0.0 }
 0x9af   : > { %2046 = vadd.xlane.f32.xlu0 %v2045_v49 }
 0xa3c   : > { %v2047_v50 = vpop.xlane.xlu0 %2046 }
 0xa3d   : > { %v2048_v51 = vmul.f32 0.03125, %v2047_v50 }
 0xa3f   : > { %v2049_v52 = vadd.f32 1e-05, %v2048_v51 }
 0xa41   : > { %2592 = vrsqrt.f32 %v2049_v52 }
 0xa4b   : > { %v2593_v53 = vpop.eup %2592 }
 0xa4c   : > { %v2051_v55 = vmul.f32 %v2593_v53, %v2043_v47  ;;  %2070 = sbr.rel (%p2343_p11) target bundleno = 2643 (0xa53), region = 84 }
 0xa4e   : > { %v2058_v24 = vmul.f32 %v2341_v54, %v2051_v55 }
 0xa50   : > { %v2065_v57 = vadd.f32 %v2342_v56, %v2058_v24 }
 0xa52   : > { %2066 = vst.msk [vmem:[#allocation2] sm:$0xff] %vm693_vm2, %v2065_v57  ;;  %2071 = vst.msk [vmem:[%s2996_s7] sm:$0xff] (!%p2343_p11), %vm693_vm2, %v2065_v57 }
 0xa53 PF: > { %s3351_s18 = sld [smem:[#allocation12_spill]]  ;;  %s3352_s22 = sld [smem:[#allocation21_spill]] }
 0xa54   : > { %s3353_s23 = sld [smem:[#allocation18_spill]]  ;;  %s3354_s12 = sld [smem:[#allocation29_spill]] }
 0xa55   : > { %s2086_s29 = sshll.u32 %s2996_s7, 4  ;;  %s2737_s28 = smov [#allocation6]   ;;  %s2087_s29 = int_to_ptr.vmem [resolvable:$true] %s2086_s29 }
 0xa56   : > { %s2624_s25 = scalar_lea.vmem %s2087_s29, 128  ;;  %s2628_s6 = sshll.u32 %s2737_s28, 4  ;;  %s2629_s6 = int_to_ptr.vmem [resolvable:$false] %s2628_s6 }
 0xa57   : > { %p2625_p0 = scmp.ne.s32.totalorder %s2087_s29, %s2624_s25  ;;  %s2630_s26 = scalar_lea.vmem %s2629_s6, 256 }
 0xa58   : > { %p2631_p6 = scmp.lt.s32.totalorder %s2087_s29, %s2629_s6  ;;  %p2632_p3 = scmp.lt.s32.totalorder %s2630_s26, %s2624_s25 }
 0xa59   : > { %s2345_s24 = sshll.u32 %s3351_s18, 7  ;;  %s2073_s3 = scalar_lea.sflag [#allocation5], %s3352_s22 }
 0xa5a   : > { %s3234_s30 = scalar_lea.hbm %s3354_s12, %s2345_s24  ;;  %p3355_p7 = scmp.ne.s32.totalorder %s3353_s23, 0 }
 0xa5b   : > { %p2633_p8 = por %p2632_p3, %p2631_p6 }
 0xa5c   : > { %p2626_p13 = pnand %p2625_p0, %p3355_p7 }
 0xa5e   : > { %p2627_p4 = pneg %p2626_p13 }
 0xa60   : > { %p2634_p12 = pnand %p2633_p8, %p2627_p4 }
 0xa62   : > { %2637 = shalt.err (!%p2634_p12)
}
 0xa63   : > { %s2638_s7 = scalar_lea.hbm %s3234_s30, 128  ;;  %s2642_s16 = scalar_lea.hbm %s3354_s12, 256 }
 0xa64   : > { %p2639_p1 = scmp.ne.s32.totalorder %s3234_s30, %s2638_s7  ;;  %p2643_p10 = scmp.lt.u32.totalorder %s3234_s30, %s3354_s12 }
 0xa65   : > { %p2644_p9 = scmp.lt.u32.totalorder %s2642_s16, %s2638_s7  ;;  %p2646_p0 = scmp.lt.u32.totalorder %s2638_s7, %s3234_s30 }
 0xa66   : > { %p2640_p2 = pnand %p2639_p1, %p3355_p7 }
 0xa67   : > { %p2645_p11 = por %p2644_p9, %p2643_p10 }
 0xa68   : > { %p2641_p5 = pneg %p2640_p2 }
 0xa69   : > { %p2647_p13 = por %p2646_p0, %p2645_p11 }
 0xa6b   : > { %p2648_p4 = pnand %p2647_p13, %p2641_p5 }
 0xa6d   : > { %2651 = shalt.err (!%p2648_p4)
}
 0xa6e   : > { %2468 = dma.vmem_to_hbm [thread:$0]  (%p3355_p7), %s2087_s29, 128, %s3234_s30, %s2073_s3  }
 0xa6f PF: > { %s3356_s0 = sld [smem:[#allocation15_spill]]  ;;  %s3357_s27 = sld [smem:[#allocation9_spill]] }
 0xa70   : > { %s3358_s21 = sld [smem:[#allocation19_spill]] }
 0xa75   : > { %p2479_p6 = scmp.ge.s32.totalorder %s3356_s0, 2  ;;  %s2098_s17 = sand.u32 1, %s3357_s27  }
 0xa76   : > { %p3359_p3 = scmp.ne.s32.totalorder %s3358_s21, 0  ;;  %s2099_s14 = scalar_lea.sflag [#allocation5], %s2098_s17 }
 0xa78   : > { %p2475_p8 = pnand %p2479_p6, %p3359_p3 }
 0xa7a   : > { %2689 = dma.done.wait (!%p2475_p8), %s2099_s14, 128  }
 0xa7b   : > { %2691 = vsyncadd (!%p2475_p8), %s2099_s14, 4294967168  ;;  %s29_s15 = sadd.s32 1, %s3356_s0   ;;  %s3360_s25 = sld [smem:[#allocation10_spill]] }
 0xa7c   : > { %p26_p12 = scmp.ge.s32.totalorder %s29_s15, 6   ;;  %s3361_s26 = sld [smem:[#allocation11_spill]] }
 0xa7d   : > { %s3362_s27 = sld [smem:[#allocation20_spill]]  ;;  %s3363_s28 = sld [smem:[#allocation13_spill]] }
 0xa7e   : > { %s3364_s29 = sld [smem:[#allocation14_spill]]  ;;  %s3365_s30 = sld [smem:[#allocation16_spill]] }
 0xa7f   : > { %s3366_s14 = sld [smem:[#allocation17_spill]]  ;;  %28 = sbr.rel (!%p26_p12) target bundleno = 16 (0x10), region = 161 }
 0xa86   :  { %2104 = vsyncpa [#allocation4], 1 }
 0xa87   :  { %2106 = vsyncpa [#allocation4 + $0x1], 1 }
 0xa88   :  { %2107 = vsyncpa [#allocation5], 1 }
 0xa89   :  { %2109 = vsyncpa [#allocation5 + $0x1], 1 }

</bundles_post_ra>
